<compile_context>
chip_gen: v6e
topology: v6e:2x2x1
jax: 0.10.0
libtpu: 0.0.40
codegen_flags: <defaults>
</compile_context>

<pallas_src>
import math
import functools

import jax
import jax.numpy as jnp
from jax.experimental import pallas as pl
from jax.experimental.pallas import tpu as pltpu


# ----------------------------- fused Pallas kernel ---------------------------

def bert_fused_kernel(wid_ref, tt_ref, mask_ref, wproj_ref, pproj_ref,
                      ttd_ref, beff_ref, wqv_ref, bqv_ref,
                      wp_ref, bp_ref, wl_ref, bl_ref,
                      *out_refs, num_layer, num_heads, head_size, batch, seq):
    enc_refs = out_refs[:num_layer]          # L outputs, each (B, S, A)
    logits_ref = out_refs[num_layer]         # (B, num_label)
    B, S = batch, seq
    A = num_heads * head_size
    V = wproj_ref.shape[0]

    # ---- fused embedding: word one-hot matmul + pos rows + token-type blend ----
    wid = wid_ref[...]                                               # (B*S, 1) int32
    onehot = (wid == jax.lax.broadcasted_iota(jnp.int32, (B * S, V), 1)
              ).astype(jnp.float32)                                  # (B*S, V)
    y = jnp.dot(onehot, wproj_ref[...], preferred_element_type=jnp.float32)
    y = y + jnp.concatenate([pproj_ref[...]] * B, axis=0)            # positions
    y = y + tt_ref[...].astype(jnp.float32) * ttd_ref[...]           # token type
    y = y + beff_ref[...]                                            # folded biases

    # ---- LayerNorm (gamma/beta already folded into the Q/V weights at init) ----
    mean = jnp.mean(y, axis=-1, keepdims=True)
    var = jnp.mean((y - mean) ** 2, axis=-1, keepdims=True)
    h = (y - mean) * jax.lax.rsqrt(var + 1e-5)                       # (B*S, H)

    # ---- Q/V projections of BOTH layers: one lane-dense (H, L*2*A) matmul ----
    qv = jnp.dot(h, wqv_ref[...], preferred_element_type=jnp.float32) + bqv_ref[...]
    qv3 = qv.reshape(B, S, num_layer * 2 * A)

    m = mask_ref[...].reshape(B, 1, S)        # broadcasts over the query axis
    neg_bias = (1.0 - m) * 1e12               # hoisted out of the loops

    for lyr in range(num_layer):              # static, tiny loops (fully unrolled)
        q_base = 2 * lyr * A
        k_base = q_base + A                   # K == V (PyTorch module quirk)
        for hh in range(num_heads):
            lo = hh * head_size
            # Q already carries the 1/sqrt(head_size) scale (folded at init).
            qh = qv3[..., q_base + lo:q_base + lo + head_size]       # (B, S, hd)
            kh = qv3[..., k_base + lo:k_base + lo + head_size]       # (B, S, hd) == V
            s = jnp.einsum('bqd,bkd->bqk', qh, kh,
                           preferred_element_type=jnp.float32)
            s = s * m - neg_bias
            s = s - jnp.max(s, axis=-1, keepdims=True)               # stable softmax
            e = jnp.exp(s)
            p = e * pl.reciprocal(jnp.sum(e, axis=-1, keepdims=True))
            oh = jnp.einsum('bqk,bkd->bqd', p, kh,
                            preferred_element_type=jnp.float32)
            enc_refs[lyr][:, :, lo:lo + head_size] = oh.astype(enc_refs[lyr].dtype)

    # ---- pooler (CLS of last layer) + classifier ----
    # Store layout above is unchanged, so reading the CLS row back from the output
    # ref is safe (same-ref program order is respected inside the kernel).
    cls = enc_refs[num_layer - 1][:, 0, :]                           # (B, A)
    pooled = jnp.tanh(
        jnp.dot(cls, wp_ref[...], preferred_element_type=jnp.float32) + bp_ref[...])
    logits_ref[...] = (jnp.dot(pooled, wl_ref[...], preferred_element_type=jnp.float32)
                       + bl_ref[...]).astype(logits_ref.dtype)


# --------------------- one-time parameter preparation -------------------------

def prepare_params(params, cfg):
    """Init-time folds (done ONCE, never per forward call):
       * word/pos/token-type tables projected through w_emb,
       * token-type embedding as base+delta (0/1 blend), base merged into b_emb,
       * LayerNorm gamma/beta folded into the Q/V projection,
       * 1/sqrt(head_size) folded into the Q columns,
       * Q/V weights of all layers stacked into one (H, L*2*A) matrix."""
    H = cfg["hidden_size"]
    hd = cfg["head_size"]
    w_emb, b_emb = params["w_emb"], params["b_emb"]

    word_proj = params["word_table"] @ w_emb                 # (V, H)
    pos_proj = params["pos_table"] @ w_emb                   # (max_len, H)
    tt_proj = params["tt_table"] @ w_emb                     # (2, H)
    tt_delta = tt_proj[1:2] - tt_proj[0:1]                   # (1, H)
    b_eff = b_emb + tt_proj[0:1]                             # (1, H)

    gamma_col = params["ln_gamma"].reshape(H, 1)             # (H, 1)
    beta = params["ln_beta"]                                 # (1, H)
    scale = 1.0 / math.sqrt(hd)

    w_blocks, b_blocks = [], []
    for lyr in params["layers"]:
        wq_eff = gamma_col * lyr["wq"] * scale
        bq_eff = (beta @ lyr["wq"] + lyr["bq"]) * scale
        wv_eff = gamma_col * lyr["wv"]
        bv_eff = beta @ lyr["wv"] + lyr["bv"]
        w_blocks.append(jnp.concatenate([wq_eff, wv_eff], axis=1))
        b_blocks.append(jnp.concatenate([bq_eff, bv_eff], axis=1))
    w_qv = jnp.concatenate(w_blocks, axis=1)                 # (H, L*2*A)
    b_qv = jnp.concatenate(b_blocks, axis=1)                 # (1, L*2*A)

    return {
        "word_proj": word_proj, "pos_proj": pos_proj,
        "tt_delta": tt_delta, "b_eff": b_eff,
        "w_qv": w_qv, "b_qv": b_qv,
        "wp": params["wp"], "bp": params["bp"],
        "wl": params["wl"], "bl": params["bl"],
    }


# ------------------------------- wrapper --------------------------------------

def bert_only_self_forward(word_id, token_type, mask, prep, cfg):
    """Full forward pass of BERT_only_self (eval mode: dropout = identity)."""
    B, S = word_id.shape
    H = cfg["hidden_size"]
    A = cfg["all_head_size"]
    L = cfg["num_layer"]
    NL = cfg["num_label"]

    wid2 = word_id.reshape(B * S, 1).astype(jnp.int32)
    tt2 = token_type.reshape(B * S, 1).astype(jnp.int32)
    mask_f = mask.astype(jnp.float32)
    pos_proj = prep["pos_proj"]
    if pos_proj.shape[0] != S:
        pos_proj = pos_proj[:S]

    kern = functools.partial(bert_fused_kernel, num_layer=L,
                             num_heads=cfg["num_heads"],
                             head_size=cfg["head_size"], batch=B, seq=S)

    vmem = lambda: pl.BlockSpec(memory_space=pltpu.MemorySpace.VMEM)

    outs = pl.pallas_call(
        kern,
        out_shape=tuple([jax.ShapeDtypeStruct((B, S, A), jnp.float32)] * L
                        + [jax.ShapeDtypeStruct((B, NL), jnp.float32)]),
        in_specs=[vmem() for _ in range(13)],
        out_specs=tuple(vmem() for _ in range(L + 1)),
    )(wid2, tt2, mask_f, prep["word_proj"], pos_proj, prep["tt_delta"],
      prep["b_eff"], prep["w_qv"], prep["b_qv"], prep["wp"], prep["bp"],
      prep["wl"], prep["bl"])

    list_out = list(outs[:L])
    logits = outs[L]
    return logits, list_out


# ------------------------------ reference -------------------------------------

def reference_forward(word_id, token_type, mask, params, cfg):
    S = word_id.shape[1]
    nh, hd = cfg["num_heads"], cfg["head_size"]
    emb = (params["word_table"][word_id]
           + params["pos_table"][jnp.arange(S)][None]
           + params["tt_table"][token_type])
    y = emb @ params["w_emb"] + params["b_emb"]
    mean = y.mean(-1, keepdims=True)
    var = ((y - mean) ** 2).mean(-1, keepdims=True)
    h = (y - mean) / jnp.sqrt(var + 1e-5) * params["ln_gamma"] + params["ln_beta"]
    m = mask.astype(jnp.float32)[:, None, None, :]
    list_out = []
    for lyr in params["layers"]:
        q = h @ lyr["wq"] + lyr["bq"]
        kv = h @ lyr["wv"] + lyr["bv"]
        B_, S_, A = q.shape
        qh = q.reshape(B_, S_, nh, hd).transpose(0, 2, 1, 3)
        kh = kv.reshape(B_, S_, nh, hd).transpose(0, 2, 1, 3)
        att = jnp.einsum("bhqd,bhkd->bhqk", qh, kh) / math.sqrt(hd)
        att = att * m - (1.0 - m) * 1e12
        p = jax.nn.softmax(att, axis=-1)
        o = jnp.einsum("bhqk,bhkd->bhqd", p, kh).transpose(0, 2, 1, 3).reshape(B_, S_, A)
        list_out.append(o)
    cls = list_out[-1][:, 0]
    pooled = jnp.tanh(cls @ params["wp"] + params["bp"])
    return pooled @ params["wl"] + params["bl"], list_out


# ------------------------------- main ------------------------------------------

if __name__ == "__main__":
    # small config consistent with the module's __init__
    cfg = dict(hidden_size=32, num_heads=4, all_head_size=32, head_size=8,
               num_layer=2, num_label=3, max_len=8, vect_len=20, emb_dim=50)
    B, S, H, A = 2, cfg["max_len"], cfg["hidden_size"], cfg["all_head_size"]
    vocab = cfg["vect_len"] + 4

    key = jax.random.PRNGKey(0)
    ks = iter(jax.random.split(key, 32))
    nrm = lambda shp: (jax.random.normal(next(ks), shp, jnp.float32) * 0.1)

    params = {
        "word_table": nrm((vocab, cfg["emb_dim"])),
        "pos_table": nrm((cfg["max_len"], cfg["emb_dim"])),
        "tt_table": nrm((2, cfg["emb_dim"])),
        "w_emb": nrm((cfg["emb_dim"], H)),
        "b_emb": nrm((1, H)),
        "ln_gamma": jnp.ones((1, H), jnp.float32),
        "ln_beta": jnp.zeros((1, H), jnp.float32),
        "wp": nrm((A, H)),
        "bp": nrm((1, H)),
        "wl": nrm((H, cfg["num_label"])),
        "bl": nrm((1, cfg["num_label"])),
        "layers": [
            # K-projection exists in the PyTorch module but is unused in forward
            # (K = self.V(h)); only Q and V weights are materialized.
            {"wq": nrm((H, A)), "bq": nrm((1, A)),
             "wv": nrm((H, A)), "bv": nrm((1, A))}
            for _ in range(cfg["num_layer"])
        ],
    }

    # one-time parameter preparation (stacking + all linear folds)
    prep = prepare_params(params, cfg)
    jax.block_until_ready(prep)

    # deterministic inputs: token ids, token-type ids, attention mask (pad last 2)
    word_id = jax.random.randint(next(ks), (B, S), 0, vocab, jnp.int32)
    s1_len = jnp.array([3, 2], jnp.int32)
    token_type = (jnp.arange(S)[None, :] >= (2 + s1_len)[:, None]).astype(jnp.int32)
    mask = (jnp.arange(S)[None, :] < (S - 2)).astype(jnp.float32).repeat(B, axis=0)

    fwd = jax.jit(lambda w, t, m: bert_only_self_forward(w, t, m, prep, cfg))
    logits, list_out = fwd(word_id, token_type, mask)
    jax.block_until_ready(logits)
    jax.block_until_ready(list_out)

    ref_logits, ref_list = reference_forward(word_id, token_type, mask, params, cfg)
    assert jnp.allclose(logits, ref_logits, atol=1e-4, rtol=1e-4)
    for a, b in zip(list_out, ref_list):
        assert jnp.allclose(a, b, atol=1e-4, rtol=1e-4)

    print("KERNEL_OK")
</pallas_src>

<mosaic_0001>
module attributes {stable_mosaic.version = 11 : i64} {
  func.func @bert_fused_kernel(%arg0: memref<16x1xi32, #tpu.memory_space<vmem>>, %arg1: memref<16x1xi32, #tpu.memory_space<vmem>>, %arg2: memref<2x8xf32, #tpu.memory_space<vmem>>, %arg3: memref<24x32xf32, #tpu.memory_space<vmem>>, %arg4: memref<8x32xf32, #tpu.memory_space<vmem>>, %arg5: memref<1x32xf32, #tpu.memory_space<vmem>>, %arg6: memref<1x32xf32, #tpu.memory_space<vmem>>, %arg7: memref<32x128xf32, #tpu.memory_space<vmem>>, %arg8: memref<1x128xf32, #tpu.memory_space<vmem>>, %arg9: memref<32x32xf32, #tpu.memory_space<vmem>>, %arg10: memref<1x32xf32, #tpu.memory_space<vmem>>, %arg11: memref<32x3xf32, #tpu.memory_space<vmem>>, %arg12: memref<1x3xf32, #tpu.memory_space<vmem>>, %arg13: memref<2x8x32xf32, #tpu.memory_space<vmem>>, %arg14: memref<2x8x32xf32, #tpu.memory_space<vmem>>, %arg15: memref<2x3xf32, #tpu.memory_space<vmem>>) attributes {dimension_semantics = [], scalar_prefetch = 0 : i64, scratch_operands = 0 : i64, tpu.core_type = #tpu.core_type<tc>} {
    %c0 = arith.constant 0 : index
    %c0_0 = arith.constant 0 : index
    %0 = vector.load %arg0[%c0, %c0_0] : memref<16x1xi32, #tpu.memory_space<vmem>>, vector<16x1xi32>
    %1 = tpu.iota {dimensions = array<i32: 1>} : vector<16x24xi32>
    %2 = vector.broadcast %0 : vector<16x1xi32> to vector<16x24xi32>
    %3 = arith.cmpi eq, %2, %1 : vector<16x24xi32>
    %4 = arith.extui %3 : vector<16x24xi1> to vector<16x24xi32>
    %5 = arith.sitofp %4 : vector<16x24xi32> to vector<16x24xf32>
    %c0_1 = arith.constant 0 : index
    %c0_2 = arith.constant 0 : index
    %6 = vector.load %arg3[%c0_1, %c0_2] : memref<24x32xf32, #tpu.memory_space<vmem>>, vector<24x32xf32>
    %cst = arith.constant dense<0.000000e+00> : vector<16x32xf32>
    %7 = tpu.matmul %5, %6, %cst {dimension_numbers = #tpu.dot_dimension_numbers<[1], [0], [0], [1], [0, 0, 1, 1], [], []>} : vector<16x24xf32>, vector<24x32xf32>, vector<16x32xf32> -> vector<16x32xf32>
    %c0_3 = arith.constant 0 : index
    %c0_4 = arith.constant 0 : index
    %8 = vector.load %arg4[%c0_3, %c0_4] : memref<8x32xf32, #tpu.memory_space<vmem>>, vector<8x32xf32>
    %9 = tpu.concatenate %8, %8 in 0 : vector<8x32xf32>, vector<8x32xf32> -> vector<16x32xf32>
    %10 = arith.addf %7, %9 : vector<16x32xf32>
    %c0_5 = arith.constant 0 : index
    %c0_6 = arith.constant 0 : index
    %11 = vector.load %arg1[%c0_5, %c0_6] : memref<16x1xi32, #tpu.memory_space<vmem>>, vector<16x1xi32>
    %12 = arith.sitofp %11 : vector<16x1xi32> to vector<16x1xf32>
    %c0_7 = arith.constant 0 : index
    %c0_8 = arith.constant 0 : index
    %13 = vector.load %arg5[%c0_7, %c0_8] : memref<1x32xf32, #tpu.memory_space<vmem>>, vector<1x32xf32>
    %14 = vector.broadcast %12 : vector<16x1xf32> to vector<16x32xf32>
    %15 = vector.broadcast %13 : vector<1x32xf32> to vector<16x32xf32>
    %16 = arith.mulf %14, %15 : vector<16x32xf32>
    %17 = arith.addf %10, %16 : vector<16x32xf32>
    %c0_9 = arith.constant 0 : index
    %c0_10 = arith.constant 0 : index
    %18 = vector.load %arg6[%c0_9, %c0_10] : memref<1x32xf32, #tpu.memory_space<vmem>>, vector<1x32xf32>
    %19 = vector.broadcast %18 : vector<1x32xf32> to vector<16x32xf32>
    %20 = arith.addf %17, %19 : vector<16x32xf32>
    %cst_11 = arith.constant dense<0.000000e+00> : vector<16xf32>
    %21 = vector.multi_reduction <add>, %20, %cst_11 [1] : vector<16x32xf32> to vector<16xf32>
    %22 = vector.shape_cast %21 : vector<16xf32> to vector<16x1xf32>
    %cst_12 = arith.constant 3.200000e+01 : f32
    %23 = vector.broadcast %cst_12 : f32 to vector<16x1xf32>
    %24 = arith.divf %22, %23 : vector<16x1xf32>
    %25 = vector.broadcast %24 : vector<16x1xf32> to vector<16x32xf32>
    %26 = arith.subf %20, %25 : vector<16x32xf32>
    %27 = arith.mulf %26, %26 : vector<16x32xf32>
    %cst_13 = arith.constant dense<0.000000e+00> : vector<16xf32>
    %28 = vector.multi_reduction <add>, %27, %cst_13 [1] : vector<16x32xf32> to vector<16xf32>
    %29 = vector.shape_cast %28 : vector<16xf32> to vector<16x1xf32>
    %cst_14 = arith.constant 3.200000e+01 : f32
    %30 = vector.broadcast %cst_14 : f32 to vector<16x1xf32>
    %31 = arith.divf %29, %30 : vector<16x1xf32>
    %32 = vector.broadcast %24 : vector<16x1xf32> to vector<16x32xf32>
    %33 = arith.subf %20, %32 : vector<16x32xf32>
    %cst_15 = arith.constant 9.99999974E-6 : f32
    %34 = vector.broadcast %cst_15 : f32 to vector<16x1xf32>
    %35 = arith.addf %31, %34 : vector<16x1xf32>
    %36 = math.rsqrt %35 : vector<16x1xf32>
    %37 = vector.broadcast %36 : vector<16x1xf32> to vector<16x32xf32>
    %38 = arith.mulf %33, %37 : vector<16x32xf32>
    %c0_16 = arith.constant 0 : index
    %c0_17 = arith.constant 0 : index
    %39 = vector.load %arg7[%c0_16, %c0_17] : memref<32x128xf32, #tpu.memory_space<vmem>>, vector<32x128xf32>
    %cst_18 = arith.constant dense<0.000000e+00> : vector<16x128xf32>
    %40 = tpu.matmul %38, %39, %cst_18 {dimension_numbers = #tpu.dot_dimension_numbers<[1], [0], [0], [1], [0, 0, 1, 1], [], []>} : vector<16x32xf32>, vector<32x128xf32>, vector<16x128xf32> -> vector<16x128xf32>
    %c0_19 = arith.constant 0 : index
    %c0_20 = arith.constant 0 : index
    %41 = vector.load %arg8[%c0_19, %c0_20] : memref<1x128xf32, #tpu.memory_space<vmem>>, vector<1x128xf32>
    %42 = vector.broadcast %41 : vector<1x128xf32> to vector<16x128xf32>
    %43 = arith.addf %40, %42 : vector<16x128xf32>
    %44 = vector.shape_cast %43 : vector<16x128xf32> to vector<2x8x128xf32>
    %c0_21 = arith.constant 0 : index
    %c0_22 = arith.constant 0 : index
    %45 = vector.load %arg2[%c0_21, %c0_22] : memref<2x8xf32, #tpu.memory_space<vmem>>, vector<2x8xf32>
    %46 = vector.shape_cast %45 : vector<2x8xf32> to vector<2x1x8xf32>
    %cst_23 = arith.constant 1.000000e+00 : f32
    %47 = vector.broadcast %cst_23 : f32 to vector<2x1x8xf32>
    %48 = arith.subf %47, %46 : vector<2x1x8xf32>
    %cst_24 = arith.constant 9.99999995E+11 : f32
    %49 = vector.broadcast %cst_24 : f32 to vector<2x1x8xf32>
    %50 = arith.mulf %48, %49 : vector<2x1x8xf32>
    %51 = vector.extract_strided_slice %44 {offsets = [0, 0, 0], sizes = [2, 8, 8], strides = [1, 1, 1]} : vector<2x8x128xf32> to vector<2x8x8xf32>
    %52 = vector.extract_strided_slice %44 {offsets = [0, 0, 32], sizes = [2, 8, 8], strides = [1, 1, 1]} : vector<2x8x128xf32> to vector<2x8x8xf32>
    "tpu.trace_start"() <{level = 10 : i32, message = "bqd,bkd->bqk"}> : () -> ()
    %cst_25 = arith.constant dense<0.000000e+00> : vector<2x8x8xf32>
    %53 = tpu.matmul %51, %52, %cst_25 {dimension_numbers = #tpu.dot_dimension_numbers<[2], [2], [1], [1], [0, 0, 0, 1, 1, 1], [0], [0]>} : vector<2x8x8xf32>, vector<2x8x8xf32>, vector<2x8x8xf32> -> vector<2x8x8xf32>
    "tpu.trace_stop"() : () -> ()
    %54 = vector.broadcast %46 : vector<2x1x8xf32> to vector<2x8x8xf32>
    %55 = arith.mulf %53, %54 : vector<2x8x8xf32>
    %56 = vector.broadcast %50 : vector<2x1x8xf32> to vector<2x8x8xf32>
    %57 = arith.subf %55, %56 : vector<2x8x8xf32>
    %cst_26 = arith.constant dense<0xFF800000> : vector<2x8xf32>
    %58 = vector.multi_reduction <maximumf>, %57, %cst_26 [2] : vector<2x8x8xf32> to vector<2x8xf32>
    %59 = vector.shape_cast %58 : vector<2x8xf32> to vector<2x8x1xf32>
    %60 = vector.broadcast %59 : vector<2x8x1xf32> to vector<2x8x8xf32>
    %61 = arith.subf %57, %60 : vector<2x8x8xf32>
    %62 = math.exp %61 : vector<2x8x8xf32>
    %cst_27 = arith.constant dense<0.000000e+00> : vector<2x8xf32>
    %63 = vector.multi_reduction <add>, %62, %cst_27 [2] : vector<2x8x8xf32> to vector<2x8xf32>
    %64 = vector.shape_cast %63 : vector<2x8xf32> to vector<2x8x1xf32>
    %65 = tpu.reciprocal %64 : vector<2x8x1xf32> -> vector<2x8x1xf32>
    %66 = vector.broadcast %65 : vector<2x8x1xf32> to vector<2x8x8xf32>
    %67 = arith.mulf %62, %66 : vector<2x8x8xf32>
    "tpu.trace_start"() <{level = 10 : i32, message = "bqk,bkd->bqd"}> : () -> ()
    %cst_28 = arith.constant dense<0.000000e+00> : vector<2x8x8xf32>
    %68 = tpu.matmul %67, %52, %cst_28 {dimension_numbers = #tpu.dot_dimension_numbers<[2], [1], [1], [2], [0, 0, 0, 1, 1, 2], [0], [0]>} : vector<2x8x8xf32>, vector<2x8x8xf32>, vector<2x8x8xf32> -> vector<2x8x8xf32>
    "tpu.trace_stop"() : () -> ()
    %c0_29 = arith.constant 0 : index
    %c0_30 = arith.constant 0 : index
    %c0_31 = arith.constant 0 : index
    %69 = vector.load %arg13[%c0_29, %c0_30, %c0_31] : memref<2x8x32xf32, #tpu.memory_space<vmem>>, vector<2x8x8xf32>
    tpu.vector_store %arg13[%c0_29, %c0_30, %c0_31], %68 {strides = array<i32>} : memref<2x8x32xf32, #tpu.memory_space<vmem>>, vector<2x8x8xf32>,
    %70 = vector.extract_strided_slice %44 {offsets = [0, 0, 8], sizes = [2, 8, 8], strides = [1, 1, 1]} : vector<2x8x128xf32> to vector<2x8x8xf32>
    %71 = vector.extract_strided_slice %44 {offsets = [0, 0, 40], sizes = [2, 8, 8], strides = [1, 1, 1]} : vector<2x8x128xf32> to vector<2x8x8xf32>
    "tpu.trace_start"() <{level = 10 : i32, message = "bqd,bkd->bqk"}> : () -> ()
    %cst_32 = arith.constant dense<0.000000e+00> : vector<2x8x8xf32>
    %72 = tpu.matmul %70, %71, %cst_32 {dimension_numbers = #tpu.dot_dimension_numbers<[2], [2], [1], [1], [0, 0, 0, 1, 1, 1], [0], [0]>} : vector<2x8x8xf32>, vector<2x8x8xf32>, vector<2x8x8xf32> -> vector<2x8x8xf32>
    "tpu.trace_stop"() : () -> ()
    %73 = vector.broadcast %46 : vector<2x1x8xf32> to vector<2x8x8xf32>
    %74 = arith.mulf %72, %73 : vector<2x8x8xf32>
    %75 = vector.broadcast %50 : vector<2x1x8xf32> to vector<2x8x8xf32>
    %76 = arith.subf %74, %75 : vector<2x8x8xf32>
    %cst_33 = arith.constant dense<0xFF800000> : vector<2x8xf32>
    %77 = vector.multi_reduction <maximumf>, %76, %cst_33 [2] : vector<2x8x8xf32> to vector<2x8xf32>
    %78 = vector.shape_cast %77 : vector<2x8xf32> to vector<2x8x1xf32>
    %79 = vector.broadcast %78 : vector<2x8x1xf32> to vector<2x8x8xf32>
    %80 = arith.subf %76, %79 : vector<2x8x8xf32>
    %81 = math.exp %80 : vector<2x8x8xf32>
    %cst_34 = arith.constant dense<0.000000e+00> : vector<2x8xf32>
    %82 = vector.multi_reduction <add>, %81, %cst_34 [2] : vector<2x8x8xf32> to vector<2x8xf32>
    %83 = vector.shape_cast %82 : vector<2x8xf32> to vector<2x8x1xf32>
    %84 = tpu.reciprocal %83 : vector<2x8x1xf32> -> vector<2x8x1xf32>
    %85 = vector.broadcast %84 : vector<2x8x1xf32> to vector<2x8x8xf32>
    %86 = arith.mulf %81, %85 : vector<2x8x8xf32>
    "tpu.trace_start"() <{level = 10 : i32, message = "bqk,bkd->bqd"}> : () -> ()
    %cst_35 = arith.constant dense<0.000000e+00> : vector<2x8x8xf32>
    %87 = tpu.matmul %86, %71, %cst_35 {dimension_numbers = #tpu.dot_dimension_numbers<[2], [1], [1], [2], [0, 0, 0, 1, 1, 2], [0], [0]>} : vector<2x8x8xf32>, vector<2x8x8xf32>, vector<2x8x8xf32> -> vector<2x8x8xf32>
    "tpu.trace_stop"() : () -> ()
    %c0_36 = arith.constant 0 : index
    %c0_37 = arith.constant 0 : index
    %c8 = arith.constant 8 : index
    %88 = vector.load %arg13[%c0_36, %c0_37, %c8] : memref<2x8x32xf32, #tpu.memory_space<vmem>>, vector<2x8x8xf32>
    tpu.vector_store %arg13[%c0_36, %c0_37, %c8], %87 {strides = array<i32>} : memref<2x8x32xf32, #tpu.memory_space<vmem>>, vector<2x8x8xf32>,
    %89 = vector.extract_strided_slice %44 {offsets = [0, 0, 16], sizes = [2, 8, 8], strides = [1, 1, 1]} : vector<2x8x128xf32> to vector<2x8x8xf32>
    %90 = vector.extract_strided_slice %44 {offsets = [0, 0, 48], sizes = [2, 8, 8], strides = [1, 1, 1]} : vector<2x8x128xf32> to vector<2x8x8xf32>
    "tpu.trace_start"() <{level = 10 : i32, message = "bqd,bkd->bqk"}> : () -> ()
    %cst_38 = arith.constant dense<0.000000e+00> : vector<2x8x8xf32>
    %91 = tpu.matmul %89, %90, %cst_38 {dimension_numbers = #tpu.dot_dimension_numbers<[2], [2], [1], [1], [0, 0, 0, 1, 1, 1], [0], [0]>} : vector<2x8x8xf32>, vector<2x8x8xf32>, vector<2x8x8xf32> -> vector<2x8x8xf32>
    "tpu.trace_stop"() : () -> ()
    %92 = vector.broadcast %46 : vector<2x1x8xf32> to vector<2x8x8xf32>
    %93 = arith.mulf %91, %92 : vector<2x8x8xf32>
    %94 = vector.broadcast %50 : vector<2x1x8xf32> to vector<2x8x8xf32>
    %95 = arith.subf %93, %94 : vector<2x8x8xf32>
    %cst_39 = arith.constant dense<0xFF800000> : vector<2x8xf32>
    %96 = vector.multi_reduction <maximumf>, %95, %cst_39 [2] : vector<2x8x8xf32> to vector<2x8xf32>
    %97 = vector.shape_cast %96 : vector<2x8xf32> to vector<2x8x1xf32>
    %98 = vector.broadcast %97 : vector<2x8x1xf32> to vector<2x8x8xf32>
    %99 = arith.subf %95, %98 : vector<2x8x8xf32>
    %100 = math.exp %99 : vector<2x8x8xf32>
    %cst_40 = arith.constant dense<0.000000e+00> : vector<2x8xf32>
    %101 = vector.multi_reduction <add>, %100, %cst_40 [2] : vector<2x8x8xf32> to vector<2x8xf32>
    %102 = vector.shape_cast %101 : vector<2x8xf32> to vector<2x8x1xf32>
    %103 = tpu.reciprocal %102 : vector<2x8x1xf32> -> vector<2x8x1xf32>
    %104 = vector.broadcast %103 : vector<2x8x1xf32> to vector<2x8x8xf32>
    %105 = arith.mulf %100, %104 : vector<2x8x8xf32>
    "tpu.trace_start"() <{level = 10 : i32, message = "bqk,bkd->bqd"}> : () -> ()
    %cst_41 = arith.constant dense<0.000000e+00> : vector<2x8x8xf32>
    %106 = tpu.matmul %105, %90, %cst_41 {dimension_numbers = #tpu.dot_dimension_numbers<[2], [1], [1], [2], [0, 0, 0, 1, 1, 2], [0], [0]>} : vector<2x8x8xf32>, vector<2x8x8xf32>, vector<2x8x8xf32> -> vector<2x8x8xf32>
    "tpu.trace_stop"() : () -> ()
    %c0_42 = arith.constant 0 : index
    %c0_43 = arith.constant 0 : index
    %c16 = arith.constant 16 : index
    %107 = vector.load %arg13[%c0_42, %c0_43, %c16] : memref<2x8x32xf32, #tpu.memory_space<vmem>>, vector<2x8x8xf32>
    tpu.vector_store %arg13[%c0_42, %c0_43, %c16], %106 {strides = array<i32>} : memref<2x8x32xf32, #tpu.memory_space<vmem>>, vector<2x8x8xf32>,
    %108 = vector.extract_strided_slice %44 {offsets = [0, 0, 24], sizes = [2, 8, 8], strides = [1, 1, 1]} : vector<2x8x128xf32> to vector<2x8x8xf32>
    %109 = vector.extract_strided_slice %44 {offsets = [0, 0, 56], sizes = [2, 8, 8], strides = [1, 1, 1]} : vector<2x8x128xf32> to vector<2x8x8xf32>
    "tpu.trace_start"() <{level = 10 : i32, message = "bqd,bkd->bqk"}> : () -> ()
    %cst_44 = arith.constant dense<0.000000e+00> : vector<2x8x8xf32>
    %110 = tpu.matmul %108, %109, %cst_44 {dimension_numbers = #tpu.dot_dimension_numbers<[2], [2], [1], [1], [0, 0, 0, 1, 1, 1], [0], [0]>} : vector<2x8x8xf32>, vector<2x8x8xf32>, vector<2x8x8xf32> -> vector<2x8x8xf32>
    "tpu.trace_stop"() : () -> ()
    %111 = vector.broadcast %46 : vector<2x1x8xf32> to vector<2x8x8xf32>
    %112 = arith.mulf %110, %111 : vector<2x8x8xf32>
    %113 = vector.broadcast %50 : vector<2x1x8xf32> to vector<2x8x8xf32>
    %114 = arith.subf %112, %113 : vector<2x8x8xf32>
    %cst_45 = arith.constant dense<0xFF800000> : vector<2x8xf32>
    %115 = vector.multi_reduction <maximumf>, %114, %cst_45 [2] : vector<2x8x8xf32> to vector<2x8xf32>
    %116 = vector.shape_cast %115 : vector<2x8xf32> to vector<2x8x1xf32>
    %117 = vector.broadcast %116 : vector<2x8x1xf32> to vector<2x8x8xf32>
    %118 = arith.subf %114, %117 : vector<2x8x8xf32>
    %119 = math.exp %118 : vector<2x8x8xf32>
    %cst_46 = arith.constant dense<0.000000e+00> : vector<2x8xf32>
    %120 = vector.multi_reduction <add>, %119, %cst_46 [2] : vector<2x8x8xf32> to vector<2x8xf32>
    %121 = vector.shape_cast %120 : vector<2x8xf32> to vector<2x8x1xf32>
    %122 = tpu.reciprocal %121 : vector<2x8x1xf32> -> vector<2x8x1xf32>
    %123 = vector.broadcast %122 : vector<2x8x1xf32> to vector<2x8x8xf32>
    %124 = arith.mulf %119, %123 : vector<2x8x8xf32>
    "tpu.trace_start"() <{level = 10 : i32, message = "bqk,bkd->bqd"}> : () -> ()
    %cst_47 = arith.constant dense<0.000000e+00> : vector<2x8x8xf32>
    %125 = tpu.matmul %124, %109, %cst_47 {dimension_numbers = #tpu.dot_dimension_numbers<[2], [1], [1], [2], [0, 0, 0, 1, 1, 2], [0], [0]>} : vector<2x8x8xf32>, vector<2x8x8xf32>, vector<2x8x8xf32> -> vector<2x8x8xf32>
    "tpu.trace_stop"() : () -> ()
    %c0_48 = arith.constant 0 : index
    %c0_49 = arith.constant 0 : index
    %c24 = arith.constant 24 : index
    %126 = vector.load %arg13[%c0_48, %c0_49, %c24] : memref<2x8x32xf32, #tpu.memory_space<vmem>>, vector<2x8x8xf32>
    tpu.vector_store %arg13[%c0_48, %c0_49, %c24], %125 {strides = array<i32>} : memref<2x8x32xf32, #tpu.memory_space<vmem>>, vector<2x8x8xf32>,
    %127 = vector.extract_strided_slice %44 {offsets = [0, 0, 64], sizes = [2, 8, 8], strides = [1, 1, 1]} : vector<2x8x128xf32> to vector<2x8x8xf32>
    %128 = vector.extract_strided_slice %44 {offsets = [0, 0, 96], sizes = [2, 8, 8], strides = [1, 1, 1]} : vector<2x8x128xf32> to vector<2x8x8xf32>
    "tpu.trace_start"() <{level = 10 : i32, message = "bqd,bkd->bqk"}> : () -> ()
    %cst_50 = arith.constant dense<0.000000e+00> : vector<2x8x8xf32>
    %129 = tpu.matmul %127, %128, %cst_50 {dimension_numbers = #tpu.dot_dimension_numbers<[2], [2], [1], [1], [0, 0, 0, 1, 1, 1], [0], [0]>} : vector<2x8x8xf32>, vector<2x8x8xf32>, vector<2x8x8xf32> -> vector<2x8x8xf32>
    "tpu.trace_stop"() : () -> ()
    %130 = vector.broadcast %46 : vector<2x1x8xf32> to vector<2x8x8xf32>
    %131 = arith.mulf %129, %130 : vector<2x8x8xf32>
    %132 = vector.broadcast %50 : vector<2x1x8xf32> to vector<2x8x8xf32>
    %133 = arith.subf %131, %132 : vector<2x8x8xf32>
    %cst_51 = arith.constant dense<0xFF800000> : vector<2x8xf32>
    %134 = vector.multi_reduction <maximumf>, %133, %cst_51 [2] : vector<2x8x8xf32> to vector<2x8xf32>
    %135 = vector.shape_cast %134 : vector<2x8xf32> to vector<2x8x1xf32>
    %136 = vector.broadcast %135 : vector<2x8x1xf32> to vector<2x8x8xf32>
    %137 = arith.subf %133, %136 : vector<2x8x8xf32>
    %138 = math.exp %137 : vector<2x8x8xf32>
    %cst_52 = arith.constant dense<0.000000e+00> : vector<2x8xf32>
    %139 = vector.multi_reduction <add>, %138, %cst_52 [2] : vector<2x8x8xf32> to vector<2x8xf32>
    %140 = vector.shape_cast %139 : vector<2x8xf32> to vector<2x8x1xf32>
    %141 = tpu.reciprocal %140 : vector<2x8x1xf32> -> vector<2x8x1xf32>
    %142 = vector.broadcast %141 : vector<2x8x1xf32> to vector<2x8x8xf32>
    %143 = arith.mulf %138, %142 : vector<2x8x8xf32>
    "tpu.trace_start"() <{level = 10 : i32, message = "bqk,bkd->bqd"}> : () -> ()
    %cst_53 = arith.constant dense<0.000000e+00> : vector<2x8x8xf32>
    %144 = tpu.matmul %143, %128, %cst_53 {dimension_numbers = #tpu.dot_dimension_numbers<[2], [1], [1], [2], [0, 0, 0, 1, 1, 2], [0], [0]>} : vector<2x8x8xf32>, vector<2x8x8xf32>, vector<2x8x8xf32> -> vector<2x8x8xf32>
    "tpu.trace_stop"() : () -> ()
    %c0_54 = arith.constant 0 : index
    %c0_55 = arith.constant 0 : index
    %c0_56 = arith.constant 0 : index
    %145 = vector.load %arg14[%c0_54, %c0_55, %c0_56] : memref<2x8x32xf32, #tpu.memory_space<vmem>>, vector<2x8x8xf32>
    tpu.vector_store %arg14[%c0_54, %c0_55, %c0_56], %144 {strides = array<i32>} : memref<2x8x32xf32, #tpu.memory_space<vmem>>, vector<2x8x8xf32>,
    %146 = vector.extract_strided_slice %44 {offsets = [0, 0, 72], sizes = [2, 8, 8], strides = [1, 1, 1]} : vector<2x8x128xf32> to vector<2x8x8xf32>
    %147 = vector.extract_strided_slice %44 {offsets = [0, 0, 104], sizes = [2, 8, 8], strides = [1, 1, 1]} : vector<2x8x128xf32> to vector<2x8x8xf32>
    "tpu.trace_start"() <{level = 10 : i32, message = "bqd,bkd->bqk"}> : () -> ()
    %cst_57 = arith.constant dense<0.000000e+00> : vector<2x8x8xf32>
    %148 = tpu.matmul %146, %147, %cst_57 {dimension_numbers = #tpu.dot_dimension_numbers<[2], [2], [1], [1], [0, 0, 0, 1, 1, 1], [0], [0]>} : vector<2x8x8xf32>, vector<2x8x8xf32>, vector<2x8x8xf32> -> vector<2x8x8xf32>
    "tpu.trace_stop"() : () -> ()
    %149 = vector.broadcast %46 : vector<2x1x8xf32> to vector<2x8x8xf32>
    %150 = arith.mulf %148, %149 : vector<2x8x8xf32>
    %151 = vector.broadcast %50 : vector<2x1x8xf32> to vector<2x8x8xf32>
    %152 = arith.subf %150, %151 : vector<2x8x8xf32>
    %cst_58 = arith.constant dense<0xFF800000> : vector<2x8xf32>
    %153 = vector.multi_reduction <maximumf>, %152, %cst_58 [2] : vector<2x8x8xf32> to vector<2x8xf32>
    %154 = vector.shape_cast %153 : vector<2x8xf32> to vector<2x8x1xf32>
    %155 = vector.broadcast %154 : vector<2x8x1xf32> to vector<2x8x8xf32>
    %156 = arith.subf %152, %155 : vector<2x8x8xf32>
    %157 = math.exp %156 : vector<2x8x8xf32>
    %cst_59 = arith.constant dense<0.000000e+00> : vector<2x8xf32>
    %158 = vector.multi_reduction <add>, %157, %cst_59 [2] : vector<2x8x8xf32> to vector<2x8xf32>
    %159 = vector.shape_cast %158 : vector<2x8xf32> to vector<2x8x1xf32>
    %160 = tpu.reciprocal %159 : vector<2x8x1xf32> -> vector<2x8x1xf32>
    %161 = vector.broadcast %160 : vector<2x8x1xf32> to vector<2x8x8xf32>
    %162 = arith.mulf %157, %161 : vector<2x8x8xf32>
    "tpu.trace_start"() <{level = 10 : i32, message = "bqk,bkd->bqd"}> : () -> ()
    %cst_60 = arith.constant dense<0.000000e+00> : vector<2x8x8xf32>
    %163 = tpu.matmul %162, %147, %cst_60 {dimension_numbers = #tpu.dot_dimension_numbers<[2], [1], [1], [2], [0, 0, 0, 1, 1, 2], [0], [0]>} : vector<2x8x8xf32>, vector<2x8x8xf32>, vector<2x8x8xf32> -> vector<2x8x8xf32>
    "tpu.trace_stop"() : () -> ()
    %c0_61 = arith.constant 0 : index
    %c0_62 = arith.constant 0 : index
    %c8_63 = arith.constant 8 : index
    %164 = vector.load %arg14[%c0_61, %c0_62, %c8_63] : memref<2x8x32xf32, #tpu.memory_space<vmem>>, vector<2x8x8xf32>
    tpu.vector_store %arg14[%c0_61, %c0_62, %c8_63], %163 {strides = array<i32>} : memref<2x8x32xf32, #tpu.memory_space<vmem>>, vector<2x8x8xf32>,
    %165 = vector.extract_strided_slice %44 {offsets = [0, 0, 80], sizes = [2, 8, 8], strides = [1, 1, 1]} : vector<2x8x128xf32> to vector<2x8x8xf32>
    %166 = vector.extract_strided_slice %44 {offsets = [0, 0, 112], sizes = [2, 8, 8], strides = [1, 1, 1]} : vector<2x8x128xf32> to vector<2x8x8xf32>
    "tpu.trace_start"() <{level = 10 : i32, message = "bqd,bkd->bqk"}> : () -> ()
    %cst_64 = arith.constant dense<0.000000e+00> : vector<2x8x8xf32>
    %167 = tpu.matmul %165, %166, %cst_64 {dimension_numbers = #tpu.dot_dimension_numbers<[2], [2], [1], [1], [0, 0, 0, 1, 1, 1], [0], [0]>} : vector<2x8x8xf32>, vector<2x8x8xf32>, vector<2x8x8xf32> -> vector<2x8x8xf32>
    "tpu.trace_stop"() : () -> ()
    %168 = vector.broadcast %46 : vector<2x1x8xf32> to vector<2x8x8xf32>
    %169 = arith.mulf %167, %168 : vector<2x8x8xf32>
    %170 = vector.broadcast %50 : vector<2x1x8xf32> to vector<2x8x8xf32>
    %171 = arith.subf %169, %170 : vector<2x8x8xf32>
    %cst_65 = arith.constant dense<0xFF800000> : vector<2x8xf32>
    %172 = vector.multi_reduction <maximumf>, %171, %cst_65 [2] : vector<2x8x8xf32> to vector<2x8xf32>
    %173 = vector.shape_cast %172 : vector<2x8xf32> to vector<2x8x1xf32>
    %174 = vector.broadcast %173 : vector<2x8x1xf32> to vector<2x8x8xf32>
    %175 = arith.subf %171, %174 : vector<2x8x8xf32>
    %176 = math.exp %175 : vector<2x8x8xf32>
    %cst_66 = arith.constant dense<0.000000e+00> : vector<2x8xf32>
    %177 = vector.multi_reduction <add>, %176, %cst_66 [2] : vector<2x8x8xf32> to vector<2x8xf32>
    %178 = vector.shape_cast %177 : vector<2x8xf32> to vector<2x8x1xf32>
    %179 = tpu.reciprocal %178 : vector<2x8x1xf32> -> vector<2x8x1xf32>
    %180 = vector.broadcast %179 : vector<2x8x1xf32> to vector<2x8x8xf32>
    %181 = arith.mulf %176, %180 : vector<2x8x8xf32>
    "tpu.trace_start"() <{level = 10 : i32, message = "bqk,bkd->bqd"}> : () -> ()
    %cst_67 = arith.constant dense<0.000000e+00> : vector<2x8x8xf32>
    %182 = tpu.matmul %181, %166, %cst_67 {dimension_numbers = #tpu.dot_dimension_numbers<[2], [1], [1], [2], [0, 0, 0, 1, 1, 2], [0], [0]>} : vector<2x8x8xf32>, vector<2x8x8xf32>, vector<2x8x8xf32> -> vector<2x8x8xf32>
    "tpu.trace_stop"() : () -> ()
    %c0_68 = arith.constant 0 : index
    %c0_69 = arith.constant 0 : index
    %c16_70 = arith.constant 16 : index
    %183 = vector.load %arg14[%c0_68, %c0_69, %c16_70] : memref<2x8x32xf32, #tpu.memory_space<vmem>>, vector<2x8x8xf32>
    tpu.vector_store %arg14[%c0_68, %c0_69, %c16_70], %182 {strides = array<i32>} : memref<2x8x32xf32, #tpu.memory_space<vmem>>, vector<2x8x8xf32>,
    %184 = vector.extract_strided_slice %44 {offsets = [0, 0, 88], sizes = [2, 8, 8], strides = [1, 1, 1]} : vector<2x8x128xf32> to vector<2x8x8xf32>
    %185 = vector.extract_strided_slice %44 {offsets = [0, 0, 120], sizes = [2, 8, 8], strides = [1, 1, 1]} : vector<2x8x128xf32> to vector<2x8x8xf32>
    "tpu.trace_start"() <{level = 10 : i32, message = "bqd,bkd->bqk"}> : () -> ()
    %cst_71 = arith.constant dense<0.000000e+00> : vector<2x8x8xf32>
    %186 = tpu.matmul %184, %185, %cst_71 {dimension_numbers = #tpu.dot_dimension_numbers<[2], [2], [1], [1], [0, 0, 0, 1, 1, 1], [0], [0]>} : vector<2x8x8xf32>, vector<2x8x8xf32>, vector<2x8x8xf32> -> vector<2x8x8xf32>
    "tpu.trace_stop"() : () -> ()
    %187 = vector.broadcast %46 : vector<2x1x8xf32> to vector<2x8x8xf32>
    %188 = arith.mulf %186, %187 : vector<2x8x8xf32>
    %189 = vector.broadcast %50 : vector<2x1x8xf32> to vector<2x8x8xf32>
    %190 = arith.subf %188, %189 : vector<2x8x8xf32>
    %cst_72 = arith.constant dense<0xFF800000> : vector<2x8xf32>
    %191 = vector.multi_reduction <maximumf>, %190, %cst_72 [2] : vector<2x8x8xf32> to vector<2x8xf32>
    %192 = vector.shape_cast %191 : vector<2x8xf32> to vector<2x8x1xf32>
    %193 = vector.broadcast %192 : vector<2x8x1xf32> to vector<2x8x8xf32>
    %194 = arith.subf %190, %193 : vector<2x8x8xf32>
    %195 = math.exp %194 : vector<2x8x8xf32>
    %cst_73 = arith.constant dense<0.000000e+00> : vector<2x8xf32>
    %196 = vector.multi_reduction <add>, %195, %cst_73 [2] : vector<2x8x8xf32> to vector<2x8xf32>
    %197 = vector.shape_cast %196 : vector<2x8xf32> to vector<2x8x1xf32>
    %198 = tpu.reciprocal %197 : vector<2x8x1xf32> -> vector<2x8x1xf32>
    %199 = vector.broadcast %198 : vector<2x8x1xf32> to vector<2x8x8xf32>
    %200 = arith.mulf %195, %199 : vector<2x8x8xf32>
    "tpu.trace_start"() <{level = 10 : i32, message = "bqk,bkd->bqd"}> : () -> ()
    %cst_74 = arith.constant dense<0.000000e+00> : vector<2x8x8xf32>
    %201 = tpu.matmul %200, %185, %cst_74 {dimension_numbers = #tpu.dot_dimension_numbers<[2], [1], [1], [2], [0, 0, 0, 1, 1, 2], [0], [0]>} : vector<2x8x8xf32>, vector<2x8x8xf32>, vector<2x8x8xf32> -> vector<2x8x8xf32>
    "tpu.trace_stop"() : () -> ()
    %c0_75 = arith.constant 0 : index
    %c0_76 = arith.constant 0 : index
    %c24_77 = arith.constant 24 : index
    %202 = vector.load %arg14[%c0_75, %c0_76, %c24_77] : memref<2x8x32xf32, #tpu.memory_space<vmem>>, vector<2x8x8xf32>
    tpu.vector_store %arg14[%c0_75, %c0_76, %c24_77], %201 {strides = array<i32>} : memref<2x8x32xf32, #tpu.memory_space<vmem>>, vector<2x8x8xf32>,
    %c0_78 = arith.constant 0 : index
    %c0_79 = arith.constant 0 : index
    %c0_80 = arith.constant 0 : index
    %203 = vector.load %arg14[%c0_78, %c0_79, %c0_80] : memref<2x8x32xf32, #tpu.memory_space<vmem>>, vector<2x1x32xf32>
    %204 = vector.shape_cast %203 : vector<2x1x32xf32> to vector<2x32xf32>
    %c0_81 = arith.constant 0 : index
    %c0_82 = arith.constant 0 : index
    %205 = vector.load %arg9[%c0_81, %c0_82] : memref<32x32xf32, #tpu.memory_space<vmem>>, vector<32x32xf32>
    %cst_83 = arith.constant dense<0.000000e+00> : vector<2x32xf32>
    %206 = tpu.matmul %204, %205, %cst_83 {dimension_numbers = #tpu.dot_dimension_numbers<[1], [0], [0], [1], [0, 0, 1, 1], [], []>} : vector<2x32xf32>, vector<32x32xf32>, vector<2x32xf32> -> vector<2x32xf32>
    %c0_84 = arith.constant 0 : index
    %c0_85 = arith.constant 0 : index
    %207 = vector.load %arg10[%c0_84, %c0_85] : memref<1x32xf32, #tpu.memory_space<vmem>>, vector<1x32xf32>
    %208 = vector.broadcast %207 : vector<1x32xf32> to vector<2x32xf32>
    %209 = arith.addf %206, %208 : vector<2x32xf32>
    %210 = math.tanh %209 : vector<2x32xf32>
    %c0_86 = arith.constant 0 : index
    %c0_87 = arith.constant 0 : index
    %211 = vector.load %arg11[%c0_86, %c0_87] : memref<32x3xf32, #tpu.memory_space<vmem>>, vector<32x3xf32>
    %cst_88 = arith.constant dense<0.000000e+00> : vector<2x3xf32>
    %212 = tpu.matmul %210, %211, %cst_88 {dimension_numbers = #tpu.dot_dimension_numbers<[1], [0], [0], [1], [0, 0, 1, 1], [], []>} : vector<2x32xf32>, vector<32x3xf32>, vector<2x3xf32> -> vector<2x3xf32>
    %c0_89 = arith.constant 0 : index
    %c0_90 = arith.constant 0 : index
    %213 = vector.load %arg12[%c0_89, %c0_90] : memref<1x3xf32, #tpu.memory_space<vmem>>, vector<1x3xf32>
    %214 = vector.broadcast %213 : vector<1x3xf32> to vector<2x3xf32>
    %215 = arith.addf %212, %214 : vector<2x3xf32>
    %c0_91 = arith.constant 0 : index
    %c0_92 = arith.constant 0 : index
    %216 = vector.load %arg15[%c0_91, %c0_92] : memref<2x3xf32, #tpu.memory_space<vmem>>, vector<2x3xf32>
    tpu.vector_store %arg15[%c0_91, %c0_92], %215 {strides = array<i32>} : memref<2x3xf32, #tpu.memory_space<vmem>>, vector<2x3xf32>,
    return
  }
}

</mosaic_0001>

<bundles_post_ra>
// kernel: _lambda_.1
= control target key start
LH: loop header
LB: loop body
LE: loop exit
PB: predicated region body
PF: predicated region fallthrough
CT: control target
= control target key end

     0   :  { %21 = vsyncpa [#allocation3], 0  ;;  %s4599_s0 = inlined_call_operand.vmem [shape: s32[16,1], index: 0, kind: input, shape index: {}]   ;;  %s4600_s1 = inlined_call_operand.vmem [shape: s32[16,1], index: 1, kind: input, shape index: {}]   ;;  %s4601_s2 = inlined_call_operand.hbm [shape: f32[2,8], index: 2, kind: input, shape index: {}]   ;;  %s4602_s3 = inlined_call_operand.vmem [shape: f32[24,32], index: 3, kind: input, shape index: {}]   ;;  %s4603_s4 = inlined_call_operand.hbm [shape: f32[8,32], index: 4, kind: input, shape index: {}]   ;;  %s4604_s5 = inlined_call_operand.hbm [shape: f32[1,32], index: 5, kind: input, shape index: {}]   ;;  %s4605_s6 = inlined_call_operand.hbm [shape: f32[1,32], index: 6, kind: input, shape index: {}]   ;;  %s4606_s7 = inlined_call_operand.hbm [shape: f32[32,128], index: 7, kind: input, shape index: {}]   ;;  %s4607_s8 = inlined_call_operand.hbm [shape: f32[1,128], index: 8, kind: input, shape index: {}]   ;;  %s4608_s9 = inlined_call_operand.hbm [shape: f32[32,32], index: 9, kind: input, shape index: {}]   ;;  %s4609_s10 = inlined_call_operand.hbm [shape: f32[1,32], index: 10, kind: input, shape index: {}]   ;;  %s4610_s11 = inlined_call_operand.vmem [shape: f32[32,3], index: 11, kind: input, shape index: {}]   ;;  %s4611_s12 = inlined_call_operand.vmem [shape: f32[1,3], index: 12, kind: input, shape index: {}]   ;;  %s4612_s13 = inlined_call_operand.hbm [shape: f32[2,8,32], index: 13, kind: output, shape index: {0}]   ;;  %s4613_s14 = inlined_call_operand.hbm [shape: f32[2,8,32], index: 14, kind: output, shape index: {1}]   ;;  %s4614_s15 = inlined_call_operand.hbm [shape: f32[2,3], index: 15, kind: output, shape index: {2}]  }
   0x1   :  { %22 = vsyncpa [#allocation6], 0 }
   0x2   :  { %23 = vsyncpa [#allocation9], 0 }
   0x3   :  { %24 = vsyncpa [#allocation12], 0 }
   0x4   :  { %25 = vsyncpa [#allocation15], 0 }
   0x5   :  { %26 = vsyncpa [#allocation4], 0 }
   0x6   :  { %27 = vsyncpa [#allocation18], 0  ;;  %s4073_s18 = smov [#allocation5]   ;;  %s4074_s20 = smov [#allocation8]  }
   0x7   :  { %s50_s19 = sshll.u32 %s4073_s18, 4  ;;  %s70_s21 = sshll.u32 %s4074_s20, 4  ;;  %s51_s19 = int_to_ptr.vmem [resolvable:$true] %s50_s19  ;;  %s71_s21 = int_to_ptr.vmem [resolvable:$true] %s70_s21 }
   0x8   :  { %s3847_s22 = scalar_lea.vmem %s51_s19, 128  ;;  %p3852_p1 = scmp.lt.s32.totalorder %s51_s19, %s51_s19 }
   0x9   :  { %p3848_p0 = scmp.ne.s32.totalorder %s51_s19, %s3847_s22  ;;  %p3853_p2 = scmp.lt.s32.totalorder %s3847_s22, %s3847_s22 }
   0xb   :  { %p3854_p3 = por %p3853_p2, %p3852_p1 }
   0xd   :  { %p3855_p4 = pnand %p3854_p3, %p3848_p0 }
   0xf   :  { %3858 = shalt.err (!%p3855_p4)
}
  0x10   :  { %53 = dma.hbm_to_vmem [thread:$0]  %s4603_s4, 128, %s51_s19, [#allocation6]  }
  0x11   :  { %s3867_s25 = scalar_lea.vmem %s71_s21, 16  ;;  %s3871_s26 = scalar_lea.vmem %s71_s21, 32 }
  0x12   :  { %p3868_p5 = scmp.ne.s32.totalorder %s71_s21, %s3867_s25  ;;  %p3872_p6 = scmp.lt.s32.totalorder %s71_s21, %s71_s21 }
  0x13   :  { %p3873_p7 = scmp.lt.s32.totalorder %s3871_s26, %s3867_s25 }
  0x15   :  { %p3874_p8 = por %p3873_p7, %p3872_p6 }
  0x17   :  { %p3875_p9 = pnand %p3874_p8, %p3868_p5 }
  0x19   :  { %3878 = shalt.err (!%p3875_p9)
}
  0x1a   :  { %73 = dma.hbm_to_vmem [thread:$0]  %s4605_s6, 16, %s71_s21, [#allocation9]  }
  0x1b   :  { %s4075_s29 = smov [#allocation11]   ;;  %s4076_s16 = smov [#allocation2]  }
  0x1c   :  { %s92_s30 = sshll.u32 %s4075_s29, 4  ;;  %s38_s17 = sshll.u32 %s4076_s16, 4  ;;  %s93_s30 = int_to_ptr.vmem [resolvable:$true] %s92_s30  ;;  %s39_s17 = int_to_ptr.vmem [resolvable:$true] %s38_s17 }
  0x1d   :  { %s3887_s18 = scalar_lea.vmem %s93_s30, 16  ;;  %s3891_s4 = scalar_lea.vmem %s93_s30, 32 }
  0x1e   :  { %p3888_p10 = scmp.ne.s32.totalorder %s93_s30, %s3887_s18  ;;  %p3892_p11 = scmp.lt.s32.totalorder %s93_s30, %s93_s30 }
  0x1f   :  { %p3893_p12 = scmp.lt.s32.totalorder %s3891_s4, %s3887_s18 }
  0x21   :  { %p3894_p13 = por %p3893_p12, %p3892_p11 }
  0x23   :  { %p3895_p0 = pnand %p3894_p13, %p3888_p10 }
  0x25   :  { %3898 = shalt.err (!%p3895_p0)
}
  0x26   :  { %95 = dma.hbm_to_vmem [thread:$0]  %s4607_s8, 16, %s93_s30, [#allocation12]  }
  0x27   :  { %s3907_s22 = scalar_lea.vmem %s39_s17, 32  ;;  %p3912_p2 = scmp.lt.s32.totalorder %s39_s17, %s39_s17 }
  0x28   :  { %p3908_p1 = scmp.ne.s32.totalorder %s39_s17, %s3907_s22  ;;  %p3913_p3 = scmp.lt.s32.totalorder %s3907_s22, %s3907_s22 }
  0x2a   :  { %p3914_p4 = por %p3913_p3, %p3912_p2 }
  0x2c   :  { %p3915_p5 = pnand %p3914_p4, %p3908_p1 }
  0x2e   :  { %3918 = shalt.err (!%p3915_p5)
}
  0x2f   :  { %41 = dma.hbm_to_vmem [thread:$0]  %s4601_s2, 32, %s39_s17, [#allocation3]  }
  0x30   :  { %s4077_s23 = smov [#allocation7]   ;;  %s4078_s25 = smov [#allocation10]  }
  0x31   :  { %s60_s24 = sshll.u32 %s4077_s23, 4  ;;  %s79_s26 = sshll.u32 %s4078_s25, 4  ;;  %s61_s24 = int_to_ptr.vmem [resolvable:$true] %s60_s24  ;;  %s80_s26 = int_to_ptr.vmem [resolvable:$true] %s79_s26 }
  0x32   :  { %s3927_s27 = scalar_lea.vmem %s61_s24, 16  ;;  %s3931_s8 = scalar_lea.vmem %s61_s24, 32 }
  0x33   :  { %p3928_p6 = scmp.ne.s32.totalorder %s61_s24, %s3927_s27  ;;  %p3932_p7 = scmp.lt.s32.totalorder %s61_s24, %s61_s24 }
  0x34   :  { %p3933_p8 = scmp.lt.s32.totalorder %s3931_s8, %s3927_s27 }
  0x36   :  { %p3934_p9 = por %p3933_p8, %p3932_p7 }
  0x38   :  { %p3935_p10 = pnand %p3934_p9, %p3928_p6 }
  0x3a   :  { %3938 = shalt.err (!%p3935_p10)
}
  0x3b   :  { %63 = dma.hbm_to_vmem [thread:$0]  %s4604_s5, 16, %s61_s24, [#allocation6]  }
  0x3c   :  { %s3947_s30 = scalar_lea.vmem %s80_s26, 512  ;;  %p3952_p12 = scmp.lt.s32.totalorder %s80_s26, %s80_s26 }
  0x3d   :  { %p3948_p11 = scmp.ne.s32.totalorder %s80_s26, %s3947_s30  ;;  %p3953_p13 = scmp.lt.s32.totalorder %s3947_s30, %s3947_s30 }
  0x3f   :  { %p3954_p0 = por %p3953_p13, %p3952_p12 }
  0x41   :  { %p3955_p1 = pnand %p3954_p0, %p3948_p11 }
  0x43   :  { %3958 = shalt.err (!%p3955_p1)
}
  0x44   :  { %s4079_s2 = smov 128   ;;  %s4080_s16 = smov 8  }
  0x45   :  { %85 = dma.hbm_to_vmem [thread:$0]  %s4606_s7, 512, %s80_s26, [#allocation9], %s4079_s2, %s4079_s2, %s4080_s16  }
  0x46   :  { %s4081_s4 = smov [#allocation13]   ;;  %s4082_s20 = smov [#allocation14]  }
  0x47   :  { %s101_s19 = sshll.u32 %s4081_s4, 4  ;;  %s114_s5 = sshll.u32 %s4082_s20, 4  ;;  %s102_s19 = int_to_ptr.vmem [resolvable:$true] %s101_s19  ;;  %s115_s5 = int_to_ptr.vmem [resolvable:$true] %s114_s5 }
  0x48   :  { %s3967_s22 = scalar_lea.vmem %s102_s19, 512  ;;  %p3972_p3 = scmp.lt.s32.totalorder %s102_s19, %s102_s19 }
  0x49   :  { %p3968_p2 = scmp.ne.s32.totalorder %s102_s19, %s3967_s22  ;;  %p3973_p4 = scmp.lt.s32.totalorder %s3967_s22, %s3967_s22 }
  0x4b   :  { %p3974_p5 = por %p3973_p4, %p3972_p3 }
  0x4d   :  { %p3975_p6 = pnand %p3974_p5, %p3968_p2 }
  0x4f   :  { %3978 = shalt.err (!%p3975_p6)
}
  0x50   :  { %107 = dma.hbm_to_vmem [thread:$0]  %s4608_s9, 512, %s102_s19, [#allocation12], %s4079_s2, %s4079_s2, %s4080_s16  }
  0x51   :  { %s3987_s7 = scalar_lea.vmem %s115_s5, 16  ;;  %s3991_s23 = scalar_lea.vmem %s115_s5, 32 }
  0x52   :  { %p3988_p7 = scmp.ne.s32.totalorder %s115_s5, %s3987_s7  ;;  %p3992_p8 = scmp.lt.s32.totalorder %s115_s5, %s115_s5 }
  0x53   :  { %p3993_p9 = scmp.lt.s32.totalorder %s3991_s23, %s3987_s7 }
  0x55   :  { %p3994_p10 = por %p3993_p9, %p3992_p8 }
  0x57   :  { %p3995_p11 = pnand %p3994_p10, %p3988_p7 }
  0x59   :  { %3998 = shalt.err (!%p3995_p11)
}
  0x5a   :  { %117 = dma.hbm_to_vmem [thread:$0]  %s4609_s10, 16, %s115_s5, [#allocation15]  }
  0x5b   :  { %4059 = dma.done.wait [#allocation3], 32  }
  0x5c   :  { %4060 = vsyncadd [#allocation3], 4294967264 }
  0x5d   :  { %4061 = dma.done.wait [#allocation6], 144  }
  0x5e   :  { %4062 = vsyncadd [#allocation6], 4294967152 }
  0x5f   :  { %4063 = dma.done.wait [#allocation9], 528  }
  0x60   :  { %4064 = vsyncadd [#allocation9], 4294966768 }
  0x61   :  { %4065 = dma.done.wait [#allocation12], 528  }
  0x62   :  { %4066 = vsyncadd [#allocation12], 4294966768 }
  0x63   :  { %4067 = dma.done.wait [#allocation15], 16  }
  0x64   :  { %4068 = vsyncadd [#allocation15], 4294967280  ;;  %v4083_v0 = vmov 0   ;;  %v146_v1 = vld [vmem:[%s4599_s0] sm:$0xff]  ;;  %v164_v2 = vld [vmem:[%s4602_s3 + $0x10] sm:$0xff]  ;;  %v4084_v10 = vmov 0.0   ;;  %v148_v11 = vlaneseq }
  0x65   :  { %3767 = vset.pattern.permute.xlu0 %v4083_v0  ;;  %3768 = vset.pattern.permute.xlu1 %v4083_v0  ;;  %v163_v3 = vld [vmem:[%s4602_s3 + $0x8] sm:$0xff]  ;;  %v162_v5 = vld [vmem:[%s4602_s3] sm:$0xff]  ;;  %vm166_vm0 = vcmask 195584   ;;  %vm282_vm3 = vcmask 261120   ;;  %v311_v46 = vld [vmem:[#allocation10 + $0x8] sm:$0xff]  ;;  %vm4085_vm4 = vmmov 0  }
  0x66   :  { %151 = vperm.xlu0 %3767, %v146_v1   ;;  %v147_v4 = vld [vmem:[%s4599_s0 + $0x8] sm:$0xff]  ;;  %3534 = vmatprep.subr.mxu0 %v164_v2  ;;  %v248_v6 = vld [vmem:[%s4600_s1] sm:$0xff]  ;;  %v149_v12 = vand.u32 127, %v148_v11  ;;  %s4086_s0 = smov 96   ;;  %vm435_vm5 = vcmask 64512   ;;  %s4089_s3 = smov 120  }
  0x67   :  { %3535 = vmatpush3.msra.mxu0 %v164_v2  ;;  %v249_v7 = vld [vmem:[%s4600_s1 + $0x8] sm:$0xff]  ;;  %v250_v8 = vcvt.s32.f32 %v248_v6  ;;  %v312_v45 = vld [vmem:[#allocation10 + $0x10] sm:$0xff]  ;;  %v4087_v1 = vmov 1966171168   ;;  %s4088_s1 = smov 88   ;;  %s4090_s22 = smov 80  }
  0x68   :  { %3536 = vmatprep.subr.mxu0 %v163_v3  ;;  %v251_v9 = vcvt.s32.f32 %v249_v7  ;;  %v3391_v18 = vld [vmem:[#allocation7] ss:$0 sm:$0xff]  ;;  %v165_v20 = vld [vmem:[#allocation5] sm:$0xff]  ;;  %v3392_v26 = vld [vmem:[#allocation8] ss:$0 sm:$0xff]  ;;  %v413_v2 = vunpack.c.l.s4 %v4087_v1  ;;  %s4091_s6 = smov 112  }
  0x69   :  { %3537 = vmatpush3.msra.mxu0 %v163_v3  ;;  %255 = vperm.xlu1 %3768, %v250_v8   ;;  %v313_v44 = vld [vmem:[#allocation10 + $0x18] sm:$0xff]  ;;  %v310_v47 = vld [vmem:[#allocation10] sm:$0xff]  ;;  %s4092_s21 = smov 72   ;;  %s4093_s7 = smov 104   ;;  %vm1123_vm6 = vcmask 130112   ;;  %vm1464_vm7 = vcmask 195712  }
  0x6a   :  { %154 = vperm.xlu0 %3767, %v147_v4   ;;  %3538 = vmatprep.subr.mxu0 %v162_v5  ;;  %v3393_v58 = vld [vmem:[#allocation11] ss:$0 sm:$0xff]  ;;  %v414_v3 = vunpack.c.0.s8 %v413_v2  ;;  %v416_v4 = vshrl.u32 %v148_v11, 7  ;;  %s4094_s23 = smov 32   ;;  %s4095_s24 = smov 64   ;;  %vm1805_vm8 = vcmask 261312  }
  0x6b   :  { %3539 = vmatpush3.msra.mxu0 %v162_v5  ;;  %3543 = vmatprep.subr.mxu1 %v313_v44  ;;  %v3396_v5 = vld.sshfl [vmem:[#allocation2] sm:$0x11 pattern:$0x75316420]  ;;  %s4096_s25 = smov 24   ;;  %s4097_s9 = smov 56  }
  0x6c   :  { %3554 = vmatprep.subr.mxu0 %v4084_v10  ;;  %3544 = vmatpush3.msra.mxu1 %v313_v44  ;;  %v411_v6 = vcombine.high %v3396_v5, %v3396_v5  ;;  %v417_v7 = vsub.s32 %v414_v3, %v416_v4  ;;  %s4098_s26 = smov 16   ;;  %s4099_s27 = smov 48   ;;  %vm3176_vm9 = vcmask 1041409  }
  0x6d   :  { %260 = vperm.xlu1 %3768, %v251_v9   ;;  %3545 = vmatprep.subr.mxu1 %v312_v45  ;;  %s4100_s10 = smov 40   ;;  %s4101_s20 = smov [#allocation17]  }
  0x6e   :  { %3546 = vmatpush3.msra.mxu1 %v312_v45  ;;  %v425_v8 = vrot.slane %v411_v6, %v417_v7  ;;  %v418_v9 = vrot.slane %v3396_v5, %v417_v7  ;;  %s3354_s5 = sshll.u32 %s4101_s20, 4  ;;  %s3355_s5 = int_to_ptr.vmem [resolvable:$true] %s3354_s5 }
  0x6f   :  { %3547 = vmatprep.subr.mxu1 %v311_v46  ;;  %p4004_p13 = scmp.lt.s32.totalorder %s3355_s5, %s3355_s5 }
  0x70   :  { %3548 = vmatpush3.msra.mxu1 %v311_v46 }
  0x71   :  { %3549 = vmatprep.subr.mxu1 %v310_v47 }
  0x72   :  { %3550 = vmatpush3.msra.mxu1 %v310_v47 }
  0x73   :  { %3559 = vmatprep.subr.mxu1 %v4084_v10 }
  0xe1   :  { %v152_v13 = vpop.permute.xlu0 %151 }
  0xe2   :  { %vm156_vm1 = vcmp.eq.s32.totalorder %v152_v13, %v149_v12  ;;  %v428_v13 = vsub.f32 1.0, %v418_v9 }
  0xe3   :  { %v3387_v14 = vsel %vm156_vm1, 1.0, %v4084_v10 }
  0xe4   :  { %3540 = vmatprep.mubr.msk.f32.mxu0 %vm166_vm0, %v3387_v14  ;;  %v256_v17 = vpop.permute.xlu1 %255  ;;  %v589_v14 = vsub.s32 0, %v416_v4 }
  0xe5   :  { %v155_v15 = vpop.permute.xlu0 %154  ;;  %v269_v23 = vmul.f32 %v3391_v18, %v256_v17 }
  0xe6   :  { %vm157_vm2 = vcmp.eq.s32.totalorder %v155_v15, %v149_v12  ;;  %v429_v12 = vsub.f32 1.0, %v425_v8  ;;  %v4271_v17 = vrot.slane %v425_v8, %v589_v14 }
  0xe7   :  { %v3388_v16 = vsel %vm157_vm2, 1.0, %v4084_v10 }
  0xe8   :  { %3541 = vmatmul.mubr.msk.f32.vlgmr.msra.gmra.mxu0 %vm166_vm0, %v3388_v16  ;;  %v261_v19 = vpop.permute.xlu1 %260  ;;  %v431_v15 = vmul.f32 1e+12, %v429_v12  ;;  %v430_v16 = vmul.f32 1e+12, %v428_v13 }
  0xe9   :  { %v270_v21 = vmul.f32 %v3391_v18, %v261_v19  ;;  %3556 = vmatprep.mubr.msk.f32.mxu0 %vm4085_vm4, %v4084_v10  ;;  %v4273_v18 = vrot.slane %v418_v9, %v589_v14 }
  0xea   :  { %v4275_v19 = vrot.slane %v431_v15, %v589_v14 }
 0x1a8   :  { %v3542_v22 = vpop.f32.mrf.mxu0 }
 0x1a9   :  { %v245_v24 = vadd.f32 %v3542_v22, %v165_v20 }
 0x1aa   :  { %v239_v25 = vpop.f32.mrf.mxu0 }
 0x1ab   :  { %v272_v27 = vadd.f32 %v270_v21, %v245_v24  ;;  %v240_v28 = vadd.f32 %v239_v25, %v165_v20  ;;  %v4277_v21 = vrot.slane %v430_v16, %v589_v14 }
 0x1ad   :  { %v271_v29 = vadd.f32 %v269_v23, %v240_v28  ;;  %v281_v30 = vadd.f32 %v3392_v26, %v272_v27 }
 0x1af   :  { %v286_v31 = vsel %vm282_vm3, %v281_v30, 0.0  ;;  %v280_v32 = vadd.f32 %v3392_v26, %v271_v29 }
 0x1b0   :  { %287 = vadd.xlane.f32.xlu1 %v286_v31 }
 0x1b1   :  { %v283_v33 = vsel %vm282_vm3, %v280_v32, 0.0 }
 0x1b2   :  { %284 = vadd.xlane.f32.xlu0 %v283_v33 }
 0x239   :  { %v288_v34 = vpop.xlane.xlu1 %287 }
 0x23a   :  { %v291_v35 = vmul.f32 0.03125, %v288_v34 }
 0x23b   :  { %v285_v36 = vpop.xlane.xlu0 %284 }
 0x23c   :  { %v290_v37 = vmul.f32 0.03125, %v285_v36  ;;  %v293_v38 = vsub.f32 %v281_v30, %v291_v35 }
 0x23e   :  { %v292_v39 = vsub.f32 %v280_v32, %v290_v37  ;;  %v295_v42 = vmul.f32 %v293_v38, %v293_v38 }
 0x240   :  { %v294_v40 = vmul.f32 %v292_v39, %v292_v39  ;;  %v299_v43 = vsel %vm282_vm3, %v295_v42, 0.0 }
 0x242   :  { %v296_v41 = vsel %vm282_vm3, %v294_v40, 0.0 }
 0x243   :  { %297 = vadd.xlane.f32.xlu0 %v296_v41 }
 0x247   :  { %300 = vadd.xlane.f32.xlu0 %v299_v43 }
 0x2cc   :  { %v298_v48 = vpop.xlane.xlu0 %297 }
 0x2cd   :  { %v302_v49 = vmul.f32 0.03125, %v298_v48 }
 0x2cf   :  { %v304_v50 = vadd.f32 1e-05, %v302_v49 }
 0x2d0   :  { %v301_v51 = vpop.xlane.xlu0 %300 }
 0x2d1   :  { %3769 = vrsqrt.f32 %v304_v50  ;;  %v303_v52 = vmul.f32 0.03125, %v301_v51 }
 0x2d3   :  { %v305_v53 = vadd.f32 1e-05, %v303_v52 }
 0x2d5   :  { %3771 = vrsqrt.f32 %v305_v53 }
 0x2de   :  { %v3770_v54 = vpop.eup %3769 }
 0x2df   :  { %v308_v55 = vmul.f32 %v3770_v54, %v292_v39 }
 0x2e1   :  { %3551 = vmatprep.mubr.msk.f32.mxu1 %vm282_vm3, %v308_v55 }
 0x2e2   :  { %v3772_v56 = vpop.eup %3771 }
 0x2e3   :  { %v309_v57 = vmul.f32 %v3772_v56, %v293_v38 }
 0x2e5   :  { %3552 = vmatmul.mubr.msk.f32.vlgmr.msra.gmra.mxu1 %vm282_vm3, %v309_v57 }
 0x2e6   :  { %3561 = vmatprep.mubr.msk.f32.mxu1 %vm4085_vm4, %v4084_v10 }
 0x3a5   :  { %v3553_v59 = vpop.f32.mrf.mxu1 }
 0x3a6   :  { %v4250_v60 = vadd.f32 %v3553_v59, %v3393_v58 }
 0x3a7   :  { %v393_v61 = vpop.f32.mrf.mxu1 }
 0x3a8   :  { %v4252_v62 = vadd.f32 %v3393_v58, %v393_v61  ;;  %511 = vrot.lane.b32.xlu1 %v4250_v60, %s4086_s0 }
 0x3aa   :  { %433 = vrot.lane.b32.xlu0 %v4252_v62, %s4086_s0  ;;  %s4102_s0 = smov [#allocation16]  }
 0x41a   :  { %v512_v63 = vpop.permute.xlu1 %511 }
 0x41b   :  { %3560 = vmatpush3.xpose.msk.msra.mxu1 %vm435_vm5, %v512_v63 }
 0x41c   :  { %v434_v0 = vpop.permute.xlu0 %433  ;;  %3569 = vmatprep.subr.mxu1 %v4084_v10 }
 0x41d   :  { %3555 = vmatpush3.xpose.msk.msra.mxu0 %vm435_vm5, %v434_v0 }
 0x41e   :  { %3562 = vmatmul.mubr.msk.f32.vlgmr.msra.gmra.mxu1 %vm435_vm5, %v4250_v60  ;;  %3564 = vmatprep.subr.mxu0 %v4084_v10 }
 0x41f   :  { %3570 = vmatpush3.msra.mxu1 %v512_v63  ;;  %3571 = vmatprep.mubr.msk.f32.mxu1 %vm4085_vm4, %v4084_v10 }
 0x420   :  { %3557 = vmatmul.mubr.msk.f32.vlgmr.msra.gmra.mxu0 %vm435_vm5, %v4252_v62  ;;  %3579 = vmatprep.subr.mxu1 %v4084_v10 }
 0x421   :  { %3565 = vmatpush3.msra.mxu0 %v434_v0  ;;  %3566 = vmatprep.mubr.msk.f32.mxu0 %vm4085_vm4, %v4084_v10 }
 0x422   :  { %3574 = vmatprep.subr.mxu0 %v4084_v10 }
 0x4de   :  { %v583_v20 = vpop.f32.mrf.mxu1 }
 0x4df   :  { %v598_v11 = vmul.f32 %v4271_v17, %v583_v20 }
 0x4e0   :  { %v506_v22 = vpop.f32.mrf.mxu0  ;;  %v3563_v23 = vpop.f32.mrf.mxu1 }
 0x4e1   :  { %v597_v24 = vmul.f32 %v4273_v18, %v506_v22  ;;  %v612_v25 = vsub.f32 %v598_v11, %v4275_v19 }
 0x4e2   :  { %v3558_v26 = vpop.f32.mrf.mxu0 }
 0x4e3   :  { %v616_v27 = vsel %vm435_vm5, %v612_v25, -inf  ;;  %v611_v28 = vsub.f32 %v597_v24, %v4277_v21 }
 0x4e4   :  { %617 = vmax.xlane.f32.xlu1 %v616_v27 }
 0x4e5   :  { %v613_v29 = vsel %vm435_vm5, %v611_v28, -inf }
 0x4e6   :  { %614 = vmax.xlane.f32.xlu0 %v613_v29 }
 0x4f5   :  { %865 = vrot.lane.b32.xlu1 %v4250_v60, %s4088_s1 }
 0x56d   :  { %v618_v30 = vpop.xlane.xlu1 %617 }
 0x56e   :  { %v620_v31 = vsub.f32 %v612_v25, %v618_v30 }
 0x56f   :  { %v615_v32 = vpop.xlane.xlu0 %614 }
 0x570   :  { %v623_v33 = vmul.f32 1.442695, %v620_v31  ;;  %v619_v34 = vsub.f32 %v611_v28, %v615_v32 }
 0x571   :  { %v866_v40 = vpop.permute.xlu1 %865 }
 0x572   :  { %3773 = vpow2.f32 %v623_v33  ;;  %v621_v35 = vmul.f32 1.442695, %v619_v34 }
 0x574   :  { %3775 = vpow2.f32 %v621_v35 }
 0x57f   :  { %v3774_v36 = vpop.eup %3773 }
 0x580   :  { %v628_v37 = vsel %vm435_vm5, %v3774_v36, 0.0 }
 0x581   :  { %v3776_v38 = vpop.eup %3775  ;;  %629 = vadd.xlane.f32.xlu1 %v628_v37 }
 0x582   :  { %v625_v39 = vsel %vm435_vm5, %v3776_v38, 0.0 }
 0x583   :  { %626 = vadd.xlane.f32.xlu0 %v625_v39 }
 0x592   :  { %863 = vrot.lane.b32.xlu1 %v4250_v60, %s4089_s3 }
 0x596   :  { %785 = vrot.lane.b32.xlu1 %v4252_v62, %s4089_s3  ;;  %s3999_s3 = scalar_lea.vmem %s3355_s5, 256 }
 0x597   :  { %p4000_p12 = scmp.ne.s32.totalorder %s3355_s5, %s3999_s3  ;;  %p4005_p0 = scmp.lt.s32.totalorder %s3999_s3, %s3999_s3 }
 0x599   :  { %787 = vrot.lane.b32.xlu0 %v4252_v62, %s4088_s1  ;;  %s3342_s1 = sshll.u32 %s4102_s0, 4  ;;  %p4006_p1 = por %p4005_p0, %p4004_p13  ;;  %s3343_s1 = int_to_ptr.vmem [resolvable:$true] %s3342_s1 }
 0x59b   :  { %p4007_p2 = pnand %p4006_p1, %p4000_p12 }
 0x60a   :  { %v630_v41 = vpop.xlane.xlu1 %629 }
 0x60b   :  { %3777 = vrcp.f32 %v630_v41 }
 0x60c   :  { %v627_v42 = vpop.xlane.xlu0 %626 }
 0x60d   :  { %3779 = vrcp.f32 %v627_v42 }
 0x60e   :  { %v864_v46 = vpop.permute.xlu1 %863 }
 0x610   :  { %v788_v48 = vpop.permute.xlu0 %787 }
 0x612   :  { %v786_v49 = vpop.permute.xlu1 %785 }
 0x618   :  { %v3778_v43 = vpop.eup %3777 }
 0x619   :  { %v634_v44 = vmul.f32 %v3778_v43, %v3774_v36 }
 0x61a   :  { %v3780_v45 = vpop.eup %3779 }
 0x61b   :  { %3572 = vmatmul.mubr.msk.f32.vlgmr.msra.gmra.mxu1 %vm435_vm5, %v634_v44  ;;  %v633_v47 = vmul.f32 %v3780_v45, %v3776_v38 }
 0x61c   :  { %3580 = vmatpush3.xpose.msk.msra.mxu1 %vm435_vm5, %v866_v40  ;;  %3581 = vmatprep.mubr.msk.f32.mxu1 %vm4085_vm4, %v4084_v10 }
 0x61d   :  { %3567 = vmatmul.mubr.msk.f32.vlgmr.msra.gmra.mxu0 %vm435_vm5, %v633_v47  ;;  %3589 = vmatprep.subr.mxu1 %v4084_v10 }
 0x61e   :  { %3575 = vmatpush3.xpose.msk.msra.mxu0 %vm435_vm5, %v788_v48  ;;  %3576 = vmatprep.mubr.msk.f32.mxu0 %vm4085_vm4, %v4084_v10 }
 0x61f   :  { %3582 = vmatmul.mubr.msk.f32.vlgmr.msra.gmra.mxu1 %vm435_vm5, %v864_v46  ;;  %3584 = vmatprep.subr.mxu0 %v4084_v10 }
 0x620   :  { %3590 = vmatpush3.msra.mxu1 %v866_v40  ;;  %3591 = vmatprep.mubr.msk.f32.mxu1 %vm4085_vm4, %v4084_v10 }
 0x621   :  { %3577 = vmatmul.mubr.msk.f32.vlgmr.msra.gmra.mxu0 %vm435_vm5, %v786_v49  ;;  %3599 = vmatprep.subr.mxu1 %v4084_v10 }
 0x622   :  { %3585 = vmatpush3.msra.mxu0 %v788_v48  ;;  %3586 = vmatprep.mubr.msk.f32.mxu0 %vm4085_vm4, %v4084_v10 }
 0x623   :  { %3594 = vmatprep.subr.mxu0 %v4084_v10 }
 0x6db   :  { %v779_v50 = vpop.f32.mrf.mxu1 }
 0x6dc   :  { %784 = vst.msk [vmem:[#allocation16 + $0x8] sm:$0xff] %vm435_vm5, %v779_v50 }
 0x6dd   :  { %v705_v51 = vpop.f32.mrf.mxu0  ;;  %v3573_v52 = vpop.f32.mrf.mxu1 }
 0x6de   :  { %783 = vst.msk [vmem:[#allocation16] sm:$0xff] %vm435_vm5, %v705_v51 }
 0x6df   :  { %v3568_v53 = vpop.f32.mrf.mxu0  ;;  %v937_v54 = vpop.f32.mrf.mxu1 }
 0x6e0   :  { %v942_v55 = vmul.f32 %v937_v54, %v4271_v17 }
 0x6e1   :  { %v859_v56 = vpop.f32.mrf.mxu0  ;;  %v3583_v57 = vpop.f32.mrf.mxu1 }
 0x6e2   :  { %v941_v58 = vmul.f32 %v859_v56, %v4273_v18  ;;  %v944_v59 = vsub.f32 %v942_v55, %v4275_v19 }
 0x6e3   :  { %v3578_v61 = vpop.f32.mrf.mxu0 }
 0x6e4   :  { %v948_v63 = vsel %vm435_vm5, %v944_v59, -inf  ;;  %v943_v0 = vsub.f32 %v941_v58, %v4277_v21 }
 0x6e5   :  { %949 = vmax.xlane.f32.xlu0 %v948_v63 }
 0x6e6   :  { %v945_v1 = vsel %vm435_vm5, %v943_v0, -inf }
 0x6e7   :  { %946 = vmax.xlane.f32.xlu1 %v945_v1 }
 0x6f8   :  { %1206 = vrot.lane.b32.xlu1 %v4250_v60, %s4090_s22 }
 0x6fc   :  { %1204 = vrot.lane.b32.xlu1 %v4250_v60, %s4091_s6 }
 0x700   :  { %1126 = vrot.lane.b32.xlu1 %v4252_v62, %s4091_s6 }
 0x76e   :  { %v950_v2 = vpop.xlane.xlu0 %949 }
 0x76f   :  { %v952_v3 = vsub.f32 %v944_v59, %v950_v2 }
 0x770   :  { %v947_v4 = vpop.xlane.xlu1 %946 }
 0x771   :  { %v955_v5 = vmul.f32 1.442695, %v952_v3  ;;  %v951_v6 = vsub.f32 %v943_v0, %v947_v4 }
 0x773   :  { %3781 = vpow2.f32 %v955_v5  ;;  %v953_v7 = vmul.f32 1.442695, %v951_v6 }
 0x774   :  { %v1207_v16 = vpop.permute.xlu1 %1206 }
 0x775   :  { %3783 = vpow2.f32 %v953_v7 }
 0x778   :  { %v1205_v23 = vpop.permute.xlu1 %1204 }
 0x77c   :  { %v1127_v26 = vpop.permute.xlu1 %1126 }
 0x780   :  { %v3782_v8 = vpop.eup %3781 }
 0x781   :  { %v960_v9 = vsel %vm435_vm5, %v3782_v8, 0.0 }
 0x782   :  { %v3784_v12 = vpop.eup %3783  ;;  %961 = vadd.xlane.f32.xlu0 %v960_v9 }
 0x783   :  { %v957_v13 = vsel %vm435_vm5, %v3784_v12, 0.0 }
 0x786   :  { %958 = vadd.xlane.f32.xlu0 %v957_v13 }
 0x79c   :  { %1128 = vrot.lane.b32.xlu0 %v4252_v62, %s4090_s22 }
 0x80b   :  { %v962_v14 = vpop.xlane.xlu0 %961 }
 0x80c   :  { %3785 = vrcp.f32 %v962_v14 }
 0x80f   :  { %v959_v15 = vpop.xlane.xlu0 %958 }
 0x810   :  { %3787 = vrcp.f32 %v959_v15 }
 0x813   :  { %v1129_v25 = vpop.permute.xlu0 %1128 }
 0x819   :  { %v3786_v20 = vpop.eup %3785 }
 0x81a   :  { %v966_v11 = vmul.f32 %v3786_v20, %v3782_v8 }
 0x81c   :  { %3592 = vmatmul.mubr.msk.f32.vlgmr.msra.gmra.mxu1 %vm435_vm5, %v966_v11 }
 0x81d   :  { %v3788_v22 = vpop.eup %3787  ;;  %3600 = vmatpush3.xpose.msk.msra.mxu1 %vm435_vm5, %v1207_v16  ;;  %3601 = vmatprep.mubr.msk.f32.mxu1 %vm4085_vm4, %v4084_v10 }
 0x81e   :  { %3609 = vmatprep.subr.mxu1 %v4084_v10  ;;  %v965_v24 = vmul.f32 %v3788_v22, %v3784_v12 }
 0x820   :  { %3587 = vmatmul.mubr.msk.f32.vlgmr.msra.gmra.mxu0 %vm435_vm5, %v965_v24  ;;  %3602 = vmatmul.mubr.msk.f32.vlgmr.msra.gmra.mxu1 %vm435_vm5, %v1205_v23 }
 0x821   :  { %3595 = vmatpush3.xpose.msk.msra.mxu0 %vm435_vm5, %v1129_v25  ;;  %3610 = vmatpush3.msra.mxu1 %v1207_v16 }
 0x822   :  { %3596 = vmatprep.mubr.msk.f32.mxu0 %vm4085_vm4, %v4084_v10  ;;  %3604 = vmatprep.subr.mxu0 %v4084_v10 }
 0x823   :  { %3611 = vmatprep.mubr.msk.f32.mxu1 %vm4085_vm4, %v4084_v10  ;;  %3619 = vmatprep.subr.mxu1 %v4084_v10 }
 0x824   :  { %3597 = vmatmul.mubr.msk.f32.vlgmr.msra.gmra.mxu0 %vm435_vm5, %v1127_v26 }
 0x825   :  { %3605 = vmatpush3.msra.mxu0 %v1129_v25  ;;  %3606 = vmatprep.mubr.msk.f32.mxu0 %vm4085_vm4, %v4084_v10 }
 0x826   :  { %3614 = vmatprep.subr.mxu0 %v4084_v10 }
 0x8dc   :  { %v4341_v27 = vpop.f32.mrf.mxu1 }
 0x8de   :  { %v3593_v28 = vpop.f32.mrf.mxu1 }
 0x8e0   :  { %v4343_v29 = vpop.f32.mrf.mxu0  ;;  %v1278_v30 = vpop.f32.mrf.mxu1 }
 0x8e1   :  { %v1283_v31 = vmul.f32 %v1278_v30, %v4271_v17 }
 0x8e2   :  { %v3588_v32 = vpop.f32.mrf.mxu0  ;;  %v3603_v33 = vpop.f32.mrf.mxu1 }
 0x8e3   :  { %v1285_v34 = vsub.f32 %v1283_v31, %v4275_v19 }
 0x8e4   :  { %v1200_v35 = vpop.f32.mrf.mxu0 }
 0x8e5   :  { %v1282_v36 = vmul.f32 %v1200_v35, %v4273_v18  ;;  %v1289_v37 = vsel %vm435_vm5, %v1285_v34, -inf }
 0x8e6   :  { %1290 = vmax.xlane.f32.xlu0 %v1289_v37  ;;  %v3598_v38 = vpop.f32.mrf.mxu0 }
 0x8e7   :  { %v1284_v39 = vsub.f32 %v1282_v36, %v4277_v21 }
 0x8e9   :  { %v1286_v40 = vsel %vm435_vm5, %v1284_v39, -inf }
 0x8ea   :  { %1287 = vmax.xlane.f32.xlu1 %v1286_v40 }
 0x8fb   :  { %1547 = vrot.lane.b32.xlu1 %v4250_v60, %s4092_s21 }
 0x8ff   :  { %1545 = vrot.lane.b32.xlu1 %v4250_v60, %s4093_s7 }
 0x903   :  { %1467 = vrot.lane.b32.xlu1 %v4252_v62, %s4093_s7 }
 0x96f   :  { %v1291_v41 = vpop.xlane.xlu0 %1290 }
 0x970   :  { %v1293_v42 = vsub.f32 %v1285_v34, %v1291_v41 }
 0x972   :  { %v1296_v43 = vmul.f32 1.442695, %v1293_v42 }
 0x973   :  { %v1288_v44 = vpop.xlane.xlu1 %1287 }
 0x974   :  { %3789 = vpow2.f32 %v1296_v43  ;;  %v1292_v45 = vsub.f32 %v1284_v39, %v1288_v44 }
 0x976   :  { %v1294_v46 = vmul.f32 1.442695, %v1292_v45 }
 0x977   :  { %v1548_v53 = vpop.permute.xlu1 %1547 }
 0x978   :  { %3791 = vpow2.f32 %v1294_v46 }
 0x97b   :  { %v1546_v57 = vpop.permute.xlu1 %1545 }
 0x97f   :  { %v1468_v61 = vpop.permute.xlu1 %1467 }
 0x981   :  { %v3790_v47 = vpop.eup %3789 }
 0x982   :  { %v1301_v48 = vsel %vm435_vm5, %v3790_v47, 0.0 }
 0x983   :  { %1302 = vadd.xlane.f32.xlu0 %v1301_v48 }
 0x985   :  { %v3792_v49 = vpop.eup %3791 }
 0x986   :  { %v1298_v50 = vsel %vm435_vm5, %v3792_v49, 0.0 }
 0x987   :  { %1299 = vadd.xlane.f32.xlu0 %v1298_v50 }
 0x99d   :  { %1469 = vrot.lane.b32.xlu0 %v4252_v62, %s4092_s21 }
 0xa0c   :  { %v1303_v51 = vpop.xlane.xlu0 %1302 }
 0xa0d   :  { %3793 = vrcp.f32 %v1303_v51 }
 0xa10   :  { %v1300_v52 = vpop.xlane.xlu0 %1299 }
 0xa11   :  { %3795 = vrcp.f32 %v1300_v52 }
 0xa14   :  { %v1470_v59 = vpop.permute.xlu0 %1469 }
 0xa1a   :  { %v3794_v54 = vpop.eup %3793 }
 0xa1b   :  { %v1307_v55 = vmul.f32 %v3794_v54, %v3790_v47 }
 0xa1d   :  { %3612 = vmatmul.mubr.msk.f32.vlgmr.msra.gmra.mxu1 %vm435_vm5, %v1307_v55 }
 0xa1e   :  { %v3796_v56 = vpop.eup %3795  ;;  %3620 = vmatpush3.xpose.msk.msra.mxu1 %vm435_vm5, %v1548_v53  ;;  %3621 = vmatprep.mubr.msk.f32.mxu1 %vm4085_vm4, %v4084_v10 }
 0xa1f   :  { %3629 = vmatprep.subr.mxu1 %v4084_v10  ;;  %v1306_v58 = vmul.f32 %v3796_v56, %v3792_v49 }
 0xa21   :  { %3607 = vmatmul.mubr.msk.f32.vlgmr.msra.gmra.mxu0 %vm435_vm5, %v1306_v58  ;;  %3622 = vmatmul.mubr.msk.f32.vlgmr.msra.gmra.mxu1 %vm435_vm5, %v1546_v57 }
 0xa22   :  { %3615 = vmatpush3.xpose.msk.msra.mxu0 %vm435_vm5, %v1470_v59  ;;  %3630 = vmatpush3.msra.mxu1 %v1548_v53 }
 0xa23   :  { %3616 = vmatprep.mubr.msk.f32.mxu0 %vm4085_vm4, %v4084_v10  ;;  %3624 = vmatprep.subr.mxu0 %v4084_v10 }
 0xa24   :  { %3631 = vmatprep.mubr.msk.f32.mxu1 %vm4085_vm4, %v4084_v10  ;;  %3639 = vmatprep.subr.mxu1 %v4084_v10 }
 0xa25   :  { %3617 = vmatmul.mubr.msk.f32.vlgmr.msra.gmra.mxu0 %vm435_vm5, %v1468_v61 }
 0xa26   :  { %3625 = vmatpush3.msra.mxu0 %v1470_v59  ;;  %3626 = vmatprep.mubr.msk.f32.mxu0 %vm4085_vm4, %v4084_v10 }
 0xa27   :  { %3634 = vmatprep.subr.mxu0 %v4084_v10 }
 0xadd   :  { %v4375_v63 = vpop.f32.mrf.mxu1 }
 0xadf   :  { %v3613_v0 = vpop.f32.mrf.mxu1 }
 0xae1   :  { %v4377_v1 = vpop.f32.mrf.mxu0  ;;  %v1619_v2 = vpop.f32.mrf.mxu1 }
 0xae2   :  { %v1624_v3 = vmul.f32 %v1619_v2, %v4271_v17 }
 0xae3   :  { %v3608_v4 = vpop.f32.mrf.mxu0  ;;  %v3623_v5 = vpop.f32.mrf.mxu1 }
 0xae4   :  { %v1626_v6 = vsub.f32 %v1624_v3, %v4275_v19 }
 0xae5   :  { %v1541_v7 = vpop.f32.mrf.mxu0 }
 0xae6   :  { %v1623_v8 = vmul.f32 %v1541_v7, %v4273_v18  ;;  %v1630_v9 = vsel %vm435_vm5, %v1626_v6, -inf }
 0xae7   :  { %1631 = vmax.xlane.f32.xlu0 %v1630_v9  ;;  %v3618_v12 = vpop.f32.mrf.mxu0 }
 0xae8   :  { %v1625_v13 = vsub.f32 %v1623_v8, %v4277_v21 }
 0xaea   :  { %v1627_v14 = vsel %vm435_vm5, %v1625_v13, -inf }
 0xaeb   :  { %1628 = vmax.xlane.f32.xlu1 %v1627_v14 }
 0xafc   :  { %1888 = vrot.lane.b32.xlu1 %v4250_v60, %s4094_s23 }
 0xb00   :  { %1886 = vrot.lane.b32.xlu1 %v4250_v60, %s4095_s24 }
 0xb04   :  { %1808 = vrot.lane.b32.xlu1 %v4252_v62, %s4095_s24 }
 0xb70   :  { %v1632_v15 = vpop.xlane.xlu0 %1631 }
 0xb71   :  { %v1634_v16 = vsub.f32 %v1626_v6, %v1632_v15 }
 0xb73   :  { %v1637_v20 = vmul.f32 1.442695, %v1634_v16 }
 0xb74   :  { %v1629_v11 = vpop.xlane.xlu1 %1628 }
 0xb75   :  { %3797 = vpow2.f32 %v1637_v20  ;;  %v1633_v22 = vsub.f32 %v1625_v13, %v1629_v11 }
 0xb77   :  { %v1635_v23 = vmul.f32 1.442695, %v1633_v22 }
 0xb78   :  { %v1889_v32 = vpop.permute.xlu1 %1888 }
 0xb79   :  { %3799 = vpow2.f32 %v1635_v23 }
 0xb7c   :  { %v1887_v36 = vpop.permute.xlu1 %1886 }
 0xb80   :  { %v1809_v39 = vpop.permute.xlu1 %1808 }
 0xb82   :  { %v3798_v24 = vpop.eup %3797 }
 0xb83   :  { %v1642_v25 = vsel %vm435_vm5, %v3798_v24, 0.0 }
 0xb84   :  { %1643 = vadd.xlane.f32.xlu0 %v1642_v25 }
 0xb86   :  { %v3800_v26 = vpop.eup %3799 }
 0xb87   :  { %v1639_v28 = vsel %vm435_vm5, %v3800_v26, 0.0 }
 0xb88   :  { %1640 = vadd.xlane.f32.xlu0 %v1639_v28 }
 0xb9e   :  { %1810 = vrot.lane.b32.xlu0 %v4252_v62, %s4094_s23 }
 0xc0d   :  { %v1644_v30 = vpop.xlane.xlu0 %1643 }
 0xc0e   :  { %3801 = vrcp.f32 %v1644_v30 }
 0xc11   :  { %v1641_v31 = vpop.xlane.xlu0 %1640 }
 0xc12   :  { %3803 = vrcp.f32 %v1641_v31 }
 0xc15   :  { %v1811_v38 = vpop.permute.xlu0 %1810 }
 0xc1b   :  { %v3802_v33 = vpop.eup %3801 }
 0xc1c   :  { %v1648_v34 = vmul.f32 %v3802_v33, %v3798_v24 }
 0xc1e   :  { %3632 = vmatmul.mubr.msk.f32.vlgmr.msra.gmra.mxu1 %vm435_vm5, %v1648_v34 }
 0xc1f   :  { %v3804_v35 = vpop.eup %3803  ;;  %3640 = vmatpush3.xpose.msk.msra.mxu1 %vm435_vm5, %v1889_v32  ;;  %3641 = vmatprep.mubr.msk.f32.mxu1 %vm4085_vm4, %v4084_v10 }
 0xc20   :  { %3649 = vmatprep.subr.mxu1 %v4084_v10  ;;  %v1647_v37 = vmul.f32 %v3804_v35, %v3800_v26 }
 0xc22   :  { %3627 = vmatmul.mubr.msk.f32.vlgmr.msra.gmra.mxu0 %vm435_vm5, %v1647_v37  ;;  %3642 = vmatmul.mubr.msk.f32.vlgmr.msra.gmra.mxu1 %vm435_vm5, %v1887_v36 }
 0xc23   :  { %3635 = vmatpush3.xpose.msk.msra.mxu0 %vm435_vm5, %v1811_v38  ;;  %3650 = vmatpush3.msra.mxu1 %v1889_v32 }
 0xc24   :  { %3636 = vmatprep.mubr.msk.f32.mxu0 %vm4085_vm4, %v4084_v10  ;;  %3644 = vmatprep.subr.mxu0 %v4084_v10 }
 0xc25   :  { %3651 = vmatprep.mubr.msk.f32.mxu1 %vm4085_vm4, %v4084_v10  ;;  %3659 = vmatprep.subr.mxu1 %v4084_v10 }
 0xc26   :  { %3637 = vmatmul.mubr.msk.f32.vlgmr.msra.gmra.mxu0 %vm435_vm5, %v1809_v39 }
 0xc27   :  { %3645 = vmatpush3.msra.mxu0 %v1811_v38  ;;  %3646 = vmatprep.mubr.msk.f32.mxu0 %vm4085_vm4, %v4084_v10 }
 0xc28   :  { %3654 = vmatprep.subr.mxu0 %v4084_v10 }
 0xcde   :  { %v4409_v40 = vpop.f32.mrf.mxu1 }
 0xce0   :  { %v3633_v41 = vpop.f32.mrf.mxu1 }
 0xce2   :  { %v4411_v42 = vpop.f32.mrf.mxu0  ;;  %v1960_v43 = vpop.f32.mrf.mxu1 }
 0xce3   :  { %v1965_v44 = vmul.f32 %v1960_v43, %v4271_v17 }
 0xce4   :  { %v3628_v45 = vpop.f32.mrf.mxu0  ;;  %v3643_v46 = vpop.f32.mrf.mxu1 }
 0xce5   :  { %v1967_v47 = vsub.f32 %v1965_v44, %v4275_v19 }
 0xce6   :  { %v1882_v48 = vpop.f32.mrf.mxu0 }
 0xce7   :  { %v1964_v49 = vmul.f32 %v1882_v48, %v4273_v18  ;;  %v1971_v50 = vsel %vm435_vm5, %v1967_v47, -inf }
 0xce8   :  { %1972 = vmax.xlane.f32.xlu0 %v1971_v50  ;;  %v3638_v51 = vpop.f32.mrf.mxu0 }
 0xce9   :  { %v1966_v52 = vsub.f32 %v1964_v49, %v4277_v21 }
 0xceb   :  { %v1968_v53 = vsel %vm435_vm5, %v1966_v52, -inf }
 0xcec   :  { %1969 = vmax.xlane.f32.xlu1 %v1968_v53 }
 0xcfd   :  { %2220 = vrot.lane.b32.xlu1 %v4250_v60, %s4096_s25 }
 0xd01   :  { %2218 = vrot.lane.b32.xlu1 %v4250_v60, %s4097_s9 }
 0xd05   :  { %2140 = vrot.lane.b32.xlu1 %v4252_v62, %s4097_s9 }
 0xd71   :  { %v1973_v54 = vpop.xlane.xlu0 %1972 }
 0xd72   :  { %v1975_v55 = vsub.f32 %v1967_v47, %v1973_v54 }
 0xd74   :  { %v1978_v56 = vmul.f32 1.442695, %v1975_v55 }
 0xd75   :  { %v1970_v57 = vpop.xlane.xlu1 %1969 }
 0xd76   :  { %3805 = vpow2.f32 %v1978_v56  ;;  %v1974_v58 = vsub.f32 %v1966_v52, %v1970_v57 }
 0xd78   :  { %v1976_v59 = vmul.f32 1.442695, %v1974_v58 }
 0xd79   :  { %v2221_v6 = vpop.permute.xlu1 %2220 }
 0xd7a   :  { %3807 = vpow2.f32 %v1976_v59 }
 0xd7d   :  { %v2219_v12 = vpop.permute.xlu1 %2218 }
 0xd81   :  { %v2141_v15 = vpop.permute.xlu1 %2140 }
 0xd83   :  { %v3806_v61 = vpop.eup %3805 }
 0xd84   :  { %v1983_v0 = vsel %vm435_vm5, %v3806_v61, 0.0 }
 0xd85   :  { %1984 = vadd.xlane.f32.xlu0 %v1983_v0 }
 0xd87   :  { %v3808_v2 = vpop.eup %3807 }
 0xd88   :  { %v1980_v3 = vsel %vm435_vm5, %v3808_v2, 0.0 }
 0xd89   :  { %1981 = vadd.xlane.f32.xlu0 %v1980_v3 }
 0xd9f   :  { %2142 = vrot.lane.b32.xlu0 %v4252_v62, %s4096_s25 }
 0xe0e   :  { %v1985_v4 = vpop.xlane.xlu0 %1984 }
 0xe0f   :  { %3809 = vrcp.f32 %v1985_v4 }
 0xe12   :  { %v1982_v5 = vpop.xlane.xlu0 %1981 }
 0xe13   :  { %3811 = vrcp.f32 %v1982_v5 }
 0xe16   :  { %v2143_v14 = vpop.permute.xlu0 %2142 }
 0xe1c   :  { %v3810_v7 = vpop.eup %3809 }
 0xe1d   :  { %v1989_v8 = vmul.f32 %v3810_v7, %v3806_v61 }
 0xe1f   :  { %3652 = vmatmul.mubr.msk.f32.vlgmr.msra.gmra.mxu1 %vm435_vm5, %v1989_v8 }
 0xe20   :  { %v3812_v9 = vpop.eup %3811  ;;  %3660 = vmatpush3.xpose.msk.msra.mxu1 %vm435_vm5, %v2221_v6  ;;  %3661 = vmatprep.mubr.msk.f32.mxu1 %vm4085_vm4, %v4084_v10 }
 0xe21   :  { %3669 = vmatprep.subr.mxu1 %v4084_v10  ;;  %v1988_v13 = vmul.f32 %v3812_v9, %v3808_v2 }
 0xe23   :  { %3647 = vmatmul.mubr.msk.f32.vlgmr.msra.gmra.mxu0 %vm435_vm5, %v1988_v13  ;;  %3662 = vmatmul.mubr.msk.f32.vlgmr.msra.gmra.mxu1 %vm435_vm5, %v2219_v12 }
 0xe24   :  { %3655 = vmatpush3.xpose.msk.msra.mxu0 %vm435_vm5, %v2143_v14  ;;  %3670 = vmatpush3.msra.mxu1 %v2221_v6 }
 0xe25   :  { %3656 = vmatprep.mubr.msk.f32.mxu0 %vm4085_vm4, %v4084_v10  ;;  %3664 = vmatprep.subr.mxu0 %v4084_v10 }
 0xe26   :  { %3671 = vmatprep.mubr.msk.f32.mxu1 %vm4085_vm4, %v4084_v10  ;;  %3679 = vmatprep.subr.mxu1 %v4084_v10 }
 0xe27   :  { %3657 = vmatmul.mubr.msk.f32.vlgmr.msra.gmra.mxu0 %vm435_vm5, %v2141_v15 }
 0xe28   :  { %3665 = vmatpush3.msra.mxu0 %v2143_v14  ;;  %3666 = vmatprep.mubr.msk.f32.mxu0 %vm4085_vm4, %v4084_v10 }
 0xe29   :  { %3674 = vmatprep.subr.mxu0 %v4084_v10 }
 0xedf   :  { %v2134_v16 = vpop.f32.mrf.mxu1 }
 0xee0   :  { %2139 = vst.msk [vmem:[#allocation17 + $0x8] sm:$0xff] %vm435_vm5, %v2134_v16 }
 0xee1   :  { %v3653_v20 = vpop.f32.mrf.mxu1 }
 0xee3   :  { %v2060_v11 = vpop.f32.mrf.mxu0  ;;  %v2292_v22 = vpop.f32.mrf.mxu1 }
 0xee4   :  { %2138 = vst.msk [vmem:[#allocation17] sm:$0xff] %vm435_vm5, %v2060_v11  ;;  %v2297_v23 = vmul.f32 %v2292_v22, %v4271_v17 }
 0xee5   :  { %v3648_v24 = vpop.f32.mrf.mxu0  ;;  %v3663_v25 = vpop.f32.mrf.mxu1 }
 0xee6   :  { %v2299_v26 = vsub.f32 %v2297_v23, %v4275_v19 }
 0xee7   :  { %v2214_v28 = vpop.f32.mrf.mxu0 }
 0xee8   :  { %v2296_v30 = vmul.f32 %v2214_v28, %v4273_v18  ;;  %v2303_v31 = vsel %vm435_vm5, %v2299_v26, -inf }
 0xee9   :  { %2304 = vmax.xlane.f32.xlu0 %v2303_v31  ;;  %v3658_v32 = vpop.f32.mrf.mxu0 }
 0xeea   :  { %v2298_v33 = vsub.f32 %v2296_v30, %v4277_v21 }
 0xeec   :  { %v2300_v34 = vsel %vm435_vm5, %v2298_v33, -inf }
 0xeed   :  { %2301 = vmax.xlane.f32.xlu1 %v2300_v34 }
 0xefe   :  { %2560 = vrot.lane.b32.xlu1 %v4250_v60, %s4098_s26 }
 0xf02   :  { %2558 = vrot.lane.b32.xlu1 %v4250_v60, %s4099_s27 }
 0xf06   :  { %2480 = vrot.lane.b32.xlu1 %v4252_v62, %s4099_s27 }
 0xf72   :  { %v2305_v35 = vpop.xlane.xlu0 %2304 }
 0xf73   :  { %v2307_v36 = vsub.f32 %v2299_v26, %v2305_v35 }
 0xf75   :  { %v2310_v37 = vmul.f32 1.442695, %v2307_v36 }
 0xf76   :  { %v2302_v38 = vpop.xlane.xlu1 %2301 }
 0xf77   :  { %3813 = vpow2.f32 %v2310_v37  ;;  %v2306_v39 = vsub.f32 %v2298_v33, %v2302_v38 }
 0xf79   :  { %v2308_v41 = vmul.f32 1.442695, %v2306_v39 }
 0xf7a   :  { %v2561_v49 = vpop.permute.xlu1 %2560 }
 0xf7b   :  { %3815 = vpow2.f32 %v2308_v41 }
 0xf7e   :  { %v2559_v53 = vpop.permute.xlu1 %2558 }
 0xf82   :  { %v2481_v56 = vpop.permute.xlu1 %2480 }
 0xf84   :  { %v3814_v43 = vpop.eup %3813 }
 0xf85   :  { %v2315_v44 = vsel %vm435_vm5, %v3814_v43, 0.0 }
 0xf86   :  { %2316 = vadd.xlane.f32.xlu0 %v2315_v44 }
 0xf88   :  { %v3816_v45 = vpop.eup %3815 }
 0xf89   :  { %v2312_v46 = vsel %vm435_vm5, %v3816_v45, 0.0 }
 0xf8a   :  { %2313 = vadd.xlane.f32.xlu0 %v2312_v46 }
 0xfa0   :  { %2482 = vrot.lane.b32.xlu0 %v4252_v62, %s4098_s26 }
0x100f   :  { %v2317_v47 = vpop.xlane.xlu0 %2316 }
0x1010   :  { %3817 = vrcp.f32 %v2317_v47 }
0x1013   :  { %v2314_v48 = vpop.xlane.xlu0 %2313 }
0x1014   :  { %3819 = vrcp.f32 %v2314_v48 }
0x1017   :  { %v2483_v55 = vpop.permute.xlu0 %2482 }
0x101d   :  { %v3818_v50 = vpop.eup %3817 }
0x101e   :  { %v2321_v51 = vmul.f32 %v3818_v50, %v3814_v43 }
0x1020   :  { %3672 = vmatmul.mubr.msk.f32.vlgmr.msra.gmra.mxu1 %vm435_vm5, %v2321_v51 }
0x1021   :  { %v3820_v52 = vpop.eup %3819  ;;  %3680 = vmatpush3.xpose.msk.msra.mxu1 %vm435_vm5, %v2561_v49  ;;  %3681 = vmatprep.mubr.msk.f32.mxu1 %vm4085_vm4, %v4084_v10 }
0x1022   :  { %3689 = vmatprep.subr.mxu1 %v4084_v10  ;;  %v2320_v54 = vmul.f32 %v3820_v52, %v3816_v45 }
0x1024   :  { %3667 = vmatmul.mubr.msk.f32.vlgmr.msra.gmra.mxu0 %vm435_vm5, %v2320_v54  ;;  %3682 = vmatmul.mubr.msk.f32.vlgmr.msra.gmra.mxu1 %vm435_vm5, %v2559_v53 }
0x1025   :  { %3675 = vmatpush3.xpose.msk.msra.mxu0 %vm435_vm5, %v2483_v55  ;;  %3690 = vmatpush3.msra.mxu1 %v2561_v49 }
0x1026   :  { %3676 = vmatprep.mubr.msk.f32.mxu0 %vm4085_vm4, %v4084_v10  ;;  %3684 = vmatprep.subr.mxu0 %v4084_v10 }
0x1027   :  { %3691 = vmatprep.mubr.msk.f32.mxu1 %vm4085_vm4, %v4084_v10  ;;  %3699 = vmatprep.subr.mxu1 %v4084_v10 }
0x1028   :  { %3677 = vmatmul.mubr.msk.f32.vlgmr.msra.gmra.mxu0 %vm435_vm5, %v2481_v56 }
0x1029   :  { %3685 = vmatpush3.msra.mxu0 %v2483_v55  ;;  %3686 = vmatprep.mubr.msk.f32.mxu0 %vm4085_vm4, %v4084_v10 }
0x102a   :  { %3694 = vmatprep.subr.mxu0 %v4084_v10 }
0x10e0   :  { %v4479_v57 = vpop.f32.mrf.mxu1 }
0x10e2   :  { %v3673_v58 = vpop.f32.mrf.mxu1 }
0x10e4   :  { %v4481_v59 = vpop.f32.mrf.mxu0  ;;  %v2632_v61 = vpop.f32.mrf.mxu1 }
0x10e5   :  { %v2637_v0 = vmul.f32 %v2632_v61, %v4271_v17 }
0x10e6   :  { %v3668_v2 = vpop.f32.mrf.mxu0  ;;  %v3683_v3 = vpop.f32.mrf.mxu1 }
0x10e7   :  { %v2639_v4 = vsub.f32 %v2637_v0, %v4275_v19 }
0x10e8   :  { %v2554_v5 = vpop.f32.mrf.mxu0 }
0x10e9   :  { %v2636_v6 = vmul.f32 %v2554_v5, %v4273_v18  ;;  %v2643_v7 = vsel %vm435_vm5, %v2639_v4, -inf }
0x10ea   :  { %2644 = vmax.xlane.f32.xlu0 %v2643_v7  ;;  %v3678_v8 = vpop.f32.mrf.mxu0 }
0x10eb   :  { %v2638_v9 = vsub.f32 %v2636_v6, %v4277_v21  ;;  %v3165_v8 = vld [vmem:[#allocation13 + $0x18] sm:$0xff] }
0x10ed   :  { %v2640_v12 = vsel %vm435_vm5, %v2638_v9, -inf }
0x10ee   :  { %2641 = vmax.xlane.f32.xlu1 %v2640_v12  ;;  %v3163_v12 = vld [vmem:[#allocation13 + $0x8] sm:$0xff] }
0x10ff   :  { %2900 = vrot.lane.b32.xlu1 %v4250_v60, %s4080_s16 }
0x1103   :  { %2898 = vrot.lane.b32.xlu1 %v4250_v60, %s4100_s10 }
0x1107   :  { %2820 = vrot.lane.b32.xlu1 %v4252_v62, %s4100_s10 }
0x1173   :  { %v2645_v13 = vpop.xlane.xlu0 %2644 }
0x1174   :  { %v2647_v14 = vsub.f32 %v2639_v4, %v2645_v13 }
0x1176   :  { %v2650_v15 = vmul.f32 1.442695, %v2647_v14  ;;  %v3162_v14 = vld [vmem:[#allocation13] sm:$0xff] }
0x1177   :  { %v2642_v16 = vpop.xlane.xlu1 %2641 }
0x1178   :  { %3821 = vpow2.f32 %v2650_v15  ;;  %v2646_v20 = vsub.f32 %v2638_v9, %v2642_v16  ;;  %v3164_v9 = vld [vmem:[#allocation13 + $0x10] sm:$0xff] }
0x117a   :  { %v2648_v11 = vmul.f32 1.442695, %v2646_v20 }
0x117b   :  { %v2901_v28 = vpop.permute.xlu1 %2900 }
0x117c   :  { %3823 = vpow2.f32 %v2648_v11 }
0x117f   :  { %v2899_v33 = vpop.permute.xlu1 %2898 }
0x1183   :  { %v2821_v35 = vpop.permute.xlu1 %2820 }
0x1185   :  { %v3822_v22 = vpop.eup %3821 }
0x1186   :  { %v2655_v23 = vsel %vm435_vm5, %v3822_v22, 0.0 }
0x1187   :  { %2656 = vadd.xlane.f32.xlu0 %v2655_v23 }
0x1189   :  { %v3824_v24 = vpop.eup %3823 }
0x118a   :  { %v2652_v25 = vsel %vm435_vm5, %v3824_v24, 0.0 }
0x118b   :  { %2653 = vadd.xlane.f32.xlu0 %v2652_v25 }
0x11a1   :  { %2822 = vrot.lane.b32.xlu0 %v4252_v62, %s4080_s16 }
0x1210   :  { %v2657_v60 = vpop.xlane.xlu0 %2656 }
0x1211   :  { %3825 = vrcp.f32 %v2657_v60 }
0x1214   :  { %v2654_v26 = vpop.xlane.xlu0 %2653 }
0x1215   :  { %3827 = vrcp.f32 %v2654_v26  ;;  %v3254_v26 = vld [vmem:[%s4610_s11 + $0x18] sm:$0xff] }
0x1218   :  { %v2823_v62 = vpop.permute.xlu0 %2822 }
0x121e   :  { %v3826_v30 = vpop.eup %3825 }
0x121f   :  { %v2661_v31 = vmul.f32 %v3826_v30, %v3822_v22  ;;  %v3252_v30 = vld [vmem:[%s4610_s11 + $0x8] sm:$0xff] }
0x1221   :  { %3692 = vmatmul.mubr.msk.f32.vlgmr.msra.gmra.mxu1 %vm435_vm5, %v2661_v31  ;;  %v3251_v31 = vld [vmem:[%s4610_s11] sm:$0xff] }
0x1222   :  { %v3828_v32 = vpop.eup %3827  ;;  %3700 = vmatpush3.xpose.msk.msra.mxu1 %vm435_vm5, %v2901_v28  ;;  %3701 = vmatprep.mubr.msk.f32.mxu1 %vm4085_vm4, %v4084_v10 }
0x1223   :  { %3709 = vmatprep.subr.mxu1 %v4084_v10  ;;  %v2660_v34 = vmul.f32 %v3828_v32, %v3824_v24  ;;  %v3445_v32 = vld [vmem:[#allocation14] ss:$0 sm:$0xff] }
0x1225   :  { %3687 = vmatmul.mubr.msk.f32.vlgmr.msra.gmra.mxu0 %vm435_vm5, %v2660_v34  ;;  %3702 = vmatmul.mubr.msk.f32.vlgmr.msra.gmra.mxu1 %vm435_vm5, %v2899_v33 }
0x1226   :  { %3695 = vmatpush3.xpose.msk.msra.mxu0 %vm435_vm5, %v2823_v62  ;;  %3710 = vmatpush3.msra.mxu1 %v2901_v28  ;;  %v3253_v28 = vld [vmem:[%s4610_s11 + $0x10] sm:$0xff] }
0x1227   :  { %3696 = vmatprep.mubr.msk.f32.mxu0 %vm4085_vm4, %v4084_v10  ;;  %3704 = vmatprep.subr.mxu0 %v4084_v10 }
0x1228   :  { %3711 = vmatprep.mubr.msk.f32.mxu1 %vm4085_vm4, %v4084_v10  ;;  %3725 = vmatprep.subr.mxu1 %v4084_v10 }
0x1229   :  { %3697 = vmatmul.mubr.msk.f32.vlgmr.msra.gmra.mxu0 %vm435_vm5, %v2821_v35 }
0x122a   :  { %3705 = vmatpush3.msra.mxu0 %v2823_v62  ;;  %3706 = vmatprep.mubr.msk.f32.mxu0 %vm4085_vm4, %v4084_v10 }
0x122b   :  { %3714 = vmatprep.subr.mxu0 %v4084_v10 }
0x12e1   :  { %v2806_v36 = vpop.f32.mrf.mxu1 }
0x12e3   :  { %v3693_v37 = vpop.f32.mrf.mxu1 }
0x12e5   :  { %v2732_v38 = vpop.f32.mrf.mxu0  ;;  %v2972_v39 = vpop.f32.mrf.mxu1 }
0x12e6   :  { %v2977_v41 = vmul.f32 %v2972_v39, %v4271_v17 }
0x12e7   :  { %v3688_v43 = vpop.f32.mrf.mxu0  ;;  %v3703_v44 = vpop.f32.mrf.mxu1 }
0x12e8   :  { %v2979_v45 = vsub.f32 %v2977_v41, %v4275_v19 }
0x12e9   :  { %v2894_v46 = vpop.f32.mrf.mxu0 }
0x12ea   :  { %v2976_v47 = vmul.f32 %v2894_v46, %v4273_v18  ;;  %v2983_v48 = vsel %vm435_vm5, %v2979_v45, -inf }
0x12eb   :  { %2984 = vmax.xlane.f32.xlu0 %v2983_v48  ;;  %v3698_v49 = vpop.f32.mrf.mxu0 }
0x12ec   :  { %v2978_v50 = vsub.f32 %v2976_v47, %v4277_v21 }
0x12ee   :  { %v2980_v51 = vsel %vm435_vm5, %v2978_v50, -inf }
0x12ef   :  { %2981 = vmax.xlane.f32.xlu1 %v2980_v51 }
0x1300   :  { %2474 = vrot.lane.b32.xlu1 %v4479_v57, %s4080_s16 }
0x1304   :  { %2472 = vrot.lane.b32.xlu1 %v4481_v59, %s4080_s16 }
0x1374   :  { %v2985_v17 = vpop.xlane.xlu0 %2984 }
0x1375   :  { %v2987_v19 = vsub.f32 %v2979_v45, %v2985_v17 }
0x1377   :  { %v2990_v52 = vmul.f32 1.442695, %v2987_v19 }
0x1378   :  { %v2982_v53 = vpop.xlane.xlu1 %2981 }
0x1379   :  { %3829 = vpow2.f32 %v2990_v52  ;;  %v2986_v18 = vsub.f32 %v2978_v50, %v2982_v53 }
0x137b   :  { %v2988_v54 = vmul.f32 1.442695, %v2986_v18 }
0x137c   :  { %v2475_v55 = vpop.permute.xlu1 %2474 }
0x137d   :  { %3831 = vpow2.f32 %v2988_v54  ;;  %2479 = vst.msk [vmem:[#allocation17 + $0x8] sm:$0xff] %vm1123_vm6, %v2475_v55 }
0x1380   :  { %v2473_v21 = vpop.permute.xlu1 %2472 }
0x1381   :  { %2478 = vst.msk [vmem:[#allocation17] sm:$0xff] %vm1123_vm6, %v2473_v21 }
0x1386   :  { %v3830_v56 = vpop.eup %3829 }
0x1387   :  { %v2995_v57 = vsel %vm435_vm5, %v3830_v56, 0.0 }
0x1388   :  { %2996 = vadd.xlane.f32.xlu0 %v2995_v57 }
0x138a   :  { %v3832_v58 = vpop.eup %3831 }
0x138b   :  { %v2992_v59 = vsel %vm435_vm5, %v3832_v58, 0.0 }
0x138c   :  { %2993 = vadd.xlane.f32.xlu0 %v2992_v59 }
0x13a2   :  { %2814 = vrot.lane.b32.xlu0 %v2806_v36, %s4098_s26 }
0x13a6   :  { %2812 = vrot.lane.b32.xlu0 %v2732_v38, %s4098_s26 }
0x13aa   :  { %1117 = vrot.lane.b32.xlu0 %v4343_v29, %s4080_s16 }
0x13ae   :  { %1458 = vrot.lane.b32.xlu0 %v4377_v1, %s4098_s26 }
0x13b2   :  { %1799 = vrot.lane.b32.xlu0 %v4411_v42, %s4096_s25 }
0x1411   :  { %v2997_v61 = vpop.xlane.xlu0 %2996 }
0x1412   :  { %3833 = vrcp.f32 %v2997_v61 }
0x1415   :  { %v2994_v0 = vpop.xlane.xlu0 %2993 }
0x1416   :  { %3835 = vrcp.f32 %v2994_v0 }
0x1419   :  { %v2815_v2 = vpop.permute.xlu0 %2814 }
0x141a   :  { %2819 = vst.msk [vmem:[#allocation17 + $0x8] sm:$0xff] %vm1464_vm7, %v2815_v2 }
0x141d   :  { %v2813_v3 = vpop.permute.xlu0 %2812 }
0x141e   :  { %2818 = vst.msk [vmem:[#allocation17] sm:$0xff] %vm1464_vm7, %v2813_v3 }
0x141f   :  { %v3834_v4 = vpop.eup %3833 }
0x1420   :  { %v3001_v5 = vmul.f32 %v3834_v4, %v3830_v56 }
0x1421   :  { %v1118_v29 = vpop.permute.xlu0 %1117 }
0x1422   :  { %1124 = vst.msk [vmem:[#allocation16] sm:$0xff] %vm1123_vm6, %v1118_v29  ;;  %3712 = vmatmul.mubr.msk.f32.vlgmr.msra.gmra.mxu1 %vm435_vm5, %v3001_v5 }
0x1423   :  { %v3836_v1 = vpop.eup %3835  ;;  %3733 = vmatprep.mubr.msk.f32.mxu1 %vm4085_vm4, %v4084_v10  ;;  %3726 = vmatpush3.msra.mxu1 %v3254_v26 }
0x1424   :  { %v3000_v42 = vmul.f32 %v3836_v1, %v3832_v58  ;;  %3727 = vmatprep.subr.mxu1 %v4084_v10 }
0x1425   :  { %v1459_v6 = vpop.permute.xlu0 %1458  ;;  %3728 = vmatpush3.msra.mxu1 %v3253_v28 }
0x1426   :  { %1465 = vst.msk [vmem:[#allocation16] sm:$0xff] %vm1464_vm7, %v1459_v6  ;;  %3707 = vmatmul.mubr.msk.f32.vlgmr.msra.gmra.mxu0 %vm435_vm5, %v3000_v42  ;;  %3729 = vmatprep.subr.mxu1 %v4084_v10 }
0x1427   :  { %3722 = vmatprep.mubr.msk.f32.mxu0 %vm4085_vm4, %v4084_v10  ;;  %3715 = vmatpush3.msra.mxu0 %v3165_v8 }
0x1428   :  { %3716 = vmatprep.subr.mxu0 %v4084_v10  ;;  %3730 = vmatpush3.msra.mxu1 %v3252_v30 }
0x1429   :  { %v1800_v7 = vpop.permute.xlu0 %1799  ;;  %3717 = vmatpush3.msra.mxu0 %v3164_v9  ;;  %3731 = vmatprep.subr.mxu1 %v4084_v10 }
0x142a   :  { %1806 = vst.msk [vmem:[#allocation16] sm:$0xff] %vm1805_vm8, %v1800_v7  ;;  %3718 = vmatprep.subr.mxu0 %v4084_v10  ;;  %3732 = vmatpush3.msra.mxu1 %v3251_v31 }
0x142b   :  { %3719 = vmatpush3.msra.mxu0 %v3163_v12 }
0x142c   :  { %3720 = vmatprep.subr.mxu0 %v4084_v10 }
0x142d   :  { %3721 = vmatpush3.msra.mxu0 %v3162_v14 }
0x14e2   :  { %v3146_v13 = vpop.f32.mrf.mxu1 }
0x14e3   :  { %3154 = vrot.lane.b32.xlu1 %v3146_v13, %s4096_s25 }
0x14e4   :  { %v3713_v15 = vpop.f32.mrf.mxu1 }
0x14e6   :  { %v3072_v16 = vpop.f32.mrf.mxu0 }
0x14e7   :  { %3152 = vrot.lane.b32.xlu1 %v3072_v16, %s4096_s25 }
0x14e8   :  { %v3708_v20 = vpop.f32.mrf.mxu0 }
0x14eb   :  { %1119 = vrot.lane.b32.xlu1 %v4341_v27, %s4080_s16 }
0x14ef   :  { %1460 = vrot.lane.b32.xlu1 %v4375_v63, %s4098_s26 }
0x14f3   :  { %1801 = vrot.lane.b32.xlu1 %v4409_v40, %s4096_s25 }
0x1555   :  { %v3155_v11 = vpop.permute.xlu1 %3154 }
0x1556   :  { %3159 = vst.msk [vmem:[#allocation17 + $0x8] sm:$0xff] %vm1805_vm8, %v3155_v11 }
0x1559   :  { %v3153_v22 = vpop.permute.xlu1 %3152 }
0x155a   :  { %3158 = vst.msk [vmem:[#allocation17] sm:$0xff] %vm1805_vm8, %v3153_v22 }
0x155d   :  { %v1120_v23 = vpop.permute.xlu1 %1119  ;;  %v3161_v24 = vld [vmem:[#allocation17 + $0x8] sm:$0x1] }
0x155e   :  { %1125 = vst.msk [vmem:[#allocation16 + $0x8] sm:$0xff] %vm1123_vm6, %v1120_v23  ;;  %v3175_v25 = vrot.slane %v3161_v24, 7 }
0x1561   :  { %v1461_v60 = vpop.permute.xlu1 %1460  ;;  %v3160_v27 = vld [vmem:[#allocation17] sm:$0x1] }
0x1562   :  { %1466 = vst.msk [vmem:[#allocation16 + $0x8] sm:$0xff] %vm1464_vm7, %v1461_v60  ;;  %v3177_v63 = vsel %vm3176_vm9, %v3175_v25, %v3160_v27 }
0x1563   :  { %3723 = vmatmul.mubr.msk.f32.vlgmr.msra.gmra.mxu0 %vm282_vm3, %v3177_v63 }
0x1565   :  { %v1802_v40 = vpop.permute.xlu1 %1801 }
0x1566   :  { %1807 = vst.msk [vmem:[#allocation16 + $0x8] sm:$0xff] %vm1805_vm8, %v1802_v40 }
0x1623   :  { %v3246_v33 = vpop.f32.mrf.mxu0 }
0x1624   :  { %v3247_v34 = vadd.f32 %v3445_v32, %v3246_v33 }
0x1625   :  { %v3724_v62 = vpop.f32.mrf.mxu0 }
0x1626   :  { %3837 = vtanh.f32 %v3247_v34 }
0x1633   :  { %v3838_v35 = vpop.eup %3837 }
0x1634   :  { %3734 = vmatmul.mubr.msk.f32.vlgmr.msra.gmra.mxu1 %vm282_vm3, %v3838_v35 }
0x1635   :  { %4010 = shalt.err (!%p4007_p2)
}
0x1636   :  { %3360 = dma.vmem_to_hbm [thread:$0]  %s3355_s5, 256, %s4613_s14, [#allocation18], %s4079_s2, %s4079_s2, %s4080_s16  }
0x1637   :  { %s4019_s6 = scalar_lea.vmem %s3343_s1, 256  ;;  %p4024_p4 = scmp.lt.s32.totalorder %s3343_s1, %s3343_s1 }
0x1638   :  { %p4020_p3 = scmp.ne.s32.totalorder %s3343_s1, %s4019_s6  ;;  %p4025_p5 = scmp.lt.s32.totalorder %s4019_s6, %s4019_s6 }
0x163a   :  { %p4026_p6 = por %p4025_p5, %p4024_p4 }
0x163c   :  { %p4027_p7 = pnand %p4026_p6, %p4020_p3 }
0x163e   :  { %4030 = shalt.err (!%p4027_p7)
}
0x163f   :  { %3348 = dma.vmem_to_hbm [thread:$0]  %s3343_s1, 256, %s4612_s13, [#allocation4], %s4079_s2, %s4079_s2, %s4080_s16   ;;  %vm3335_vm10 = vcmask 17408  }
0x1640   :  { %v3447_v10 = vld [vmem:[%s4611_s12] ss:$0 sm:$0xff]  ;;  %s4103_s14 = smov [#allocation19]  }
0x1641   :  { %s3367_s25 = sshll.u32 %s4103_s14, 4  ;;  %s3368_s25 = int_to_ptr.vmem [resolvable:$true] %s3367_s25 }
0x1642   :  { %s4039_s9 = scalar_lea.vmem %s3368_s25, 32  ;;  %p4044_p9 = scmp.lt.s32.totalorder %s3368_s25, %s3368_s25 }
0x1643   :  { %p4040_p8 = scmp.ne.s32.totalorder %s3368_s25, %s4039_s9  ;;  %p4045_p10 = scmp.lt.s32.totalorder %s4039_s9, %s4039_s9 }
0x1645   :  { %p4046_p11 = por %p4045_p10, %p4044_p9 }
0x1647   :  { %p4047_p12 = pnand %p4046_p11, %p4040_p8 }
0x16f4   :  { %v3331_v36 = vpop.f32.mrf.mxu1 }
0x16f5   :  { %v3332_v37 = vadd.f32 %v3447_v10, %v3331_v36 }
0x16f6   :  { %v3735_v38 = vpop.f32.mrf.mxu1 }
0x16f7   :  { %3336 = vst.msk [vmem:[#allocation19] sm:$0x3] %vm3335_vm10, %v3332_v37 }
0x16f8   :  { %4050 = shalt.err (!%p4047_p12)
}
0x16f9   :  { %3370 = dma.vmem_to_hbm [thread:$0]  %s3368_s25, 32, %s4614_s15, [#allocation18]  }
0x16fa   :  { %4069 = dma.done.wait [#allocation4], 256  }
0x16fb   :  { %4070 = vsyncadd [#allocation4], 4294967040 }
0x16fc   :  { %4071 = dma.done.wait [#allocation18], 288  }
0x16fd   :  { %4072 = vsyncadd [#allocation18], 4294967008 }
0x16fe   :  { %3380 = vsyncpa [#allocation3], 1 }
0x16ff   :  { %3381 = vsyncpa [#allocation6], 1 }
0x1700   :  { %3382 = vsyncpa [#allocation9], 1 }
0x1701   :  { %3383 = vsyncpa [#allocation12], 1 }
0x1702   :  { %3384 = vsyncpa [#allocation15], 1 }
0x1703   :  { %3385 = vsyncpa [#allocation4], 1 }
0x1704   :  { %3386 = vsyncpa [#allocation18], 1 }

</bundles_post_ra>
